<compile_context>
chip_gen: v7x
topology: tpu7x:2x2x1
jax: 0.10.0
libtpu: 0.0.40
codegen_flags: <defaults>
</compile_context>

<pallas_src>
import jax
import jax.numpy as jnp
from jax.experimental import pallas as pl
from jax.experimental.pallas import tpu as pltpu


def _make_kernel(use_bf16_mxu: bool):
    def kernel(xT_ref, w1c_ref, b1_ref, w2_ref, b2_ref, w3_ref, b3_ref,
               w4_ref, b4_ref, o_ref):
        d_in, h1 = w1c_ref.shape[0], w1c_ref.shape[1]     # w1c: (d_in, 256, 1)
        tm = xT_ref.shape[1]
        xT = xT_ref[...]                                  # (d_in, TM) f32, rows on lanes

        # ---- Layer 1 (d_in -> 256) on the VPU: outer-product accumulate.
        h = jnp.zeros((h1, tm), jnp.float32)
        for k in range(d_in):                             # static, tiny trip count
            h = h + w1c_ref[k] * xT[k:k + 1, :]           # (256,1)*(1,TM) -> (256,TM)
        h = jnp.maximum(h + b1_ref[...], 0.0)

        # ---- Layers 2/3 (256->128->64) on the MXU; optional bf16 operands,
        #      f32 accumulation; bias add / ReLU stay in f32.
        def mxu(w, a):
            if use_bf16_mxu:
                w = w.astype(jnp.bfloat16)
                a = a.astype(jnp.bfloat16)
            return jnp.dot(w, a, preferred_element_type=jnp.float32)

        h = jnp.maximum(mxu(w2_ref[...], h) + b2_ref[...], 0.0)   # (128, TM)
        h = jnp.maximum(mxu(w3_ref[...], h) + b3_ref[...], 0.0)   # (64, TM)

        # ---- Layer 4 (64 -> d_out) + tanh*2; lane-dense full-block store.
        z = jnp.dot(w4_ref[...], h, preferred_element_type=jnp.float32)
        o_ref[...] = jnp.tanh(z + b4_ref[...]) * 2.0

    return kernel


def _round_up(n: int, m: int) -> int:
    return ((n + m - 1) // m) * m


def _resident(a):
    """Full-array block, same tile every grid step -> DMA'd once, VMEM resident."""
    zeros = (0,) * a.ndim
    return pl.BlockSpec(a.shape, lambda i, _z=zeros: _z)


def adaptor3d_forward(adapt_obs, params, *, tm=512, use_bf16_mxu=True):
    """adapt_obs: (B, 3, d_in) float32 -> (B, 3 * d_out) float32."""
    w1, b1, w2, b2, w3, b3, w4, b4 = params   # weights (out, in) like nn.Linear, biases (out, 1)
    B, three, d_in = adapt_obs.shape
    assert three == 3, adapt_obs.shape
    d_out = w4.shape[0]

    M = B * 3
    tm_eff = max(128, min(_round_up(tm, 128), _round_up(M, 128)))
    M_pad = _round_up(M, tm_eff)
    n_tiles = M_pad // tm_eff

    # Layout glue (outside the kernel): put rows on the lane axis, zero-pad tail.
    x2d = adapt_obs.reshape(M, d_in).astype(jnp.float32)
    if M_pad != M:
        x2d = jnp.pad(x2d, ((0, M_pad - M), (0, 0)))
    xT = x2d.T                                           # (d_in, M_pad)
    w1c = w1.T[:, :, None]                               # (d_in, 256, 1) for VPU layer 1

    outT = pl.pallas_call(
        _make_kernel(use_bf16_mxu),
        out_shape=jax.ShapeDtypeStruct((d_out, M_pad), jnp.float32),
        grid=(n_tiles,),
        in_specs=[
            pl.BlockSpec((d_in, tm_eff), lambda i: (0, i)),
            _resident(w1c), _resident(b1),
            _resident(w2), _resident(b2),
            _resident(w3), _resident(b3),
            _resident(w4), _resident(b4),
        ],
        out_specs=pl.BlockSpec((d_out, tm_eff), lambda i: (0, i)),
        compiler_params=pltpu.CompilerParams(
            dimension_semantics=("parallel",)),
    )(xT, w1c, b1, w2, b2, w3, b3, w4, b4)

    return outT[:, :M].T.reshape(B, 3 * d_out)


def init_params(key, d_in, d_out):
    """Deterministic synthetic init; PyTorch nn.Linear layout: W (out,in), b (out,1)."""
    dims = [(d_in, 256), (256, 128), (128, 64), (64, d_out)]
    params = []
    for di, do in dims:
        key, kw, kb = jax.random.split(key, 3)
        scale = 1.0 / float(di) ** 0.5
        w = jax.random.uniform(kw, (do, di), jnp.float32, -scale, scale)
        b = jax.random.uniform(kb, (do, 1), jnp.float32, -scale, scale)
        params += [w, b]
    return tuple(params)


def adaptor3d_ref(adapt_obs, params, *, use_bf16_mxu=False):
    """Pure-JAX reference (mirrors the kernel's optional bf16 MXU operands)."""
    w1, b1, w2, b2, w3, b3, w4, b4 = params
    B = adapt_obs.shape[0]

    def dot(a, w):
        if use_bf16_mxu:
            a = a.astype(jnp.bfloat16)
            w = w.astype(jnp.bfloat16)
        return jnp.dot(a, w, preferred_element_type=jnp.float32)

    h = adapt_obs.reshape(B * 3, -1).astype(jnp.float32)
    h = jnp.maximum(h @ w1.T + b1.T, 0.0)          # layer 1 stays f32 (VPU in kernel)
    h = jnp.maximum(dot(h, w2.T) + b2.T, 0.0)
    h = jnp.maximum(dot(h, w3.T) + b3.T, 0.0)
    h = jnp.tanh(h @ w4.T + b4.T) * 2.0
    return h.reshape(B, -1)


if __name__ == "__main__":
    # Shapes consistent with the module: adapt_dim=12 -> d_in=4, output_dim=6 -> d_out=2,
    # batch=2 (horizon is unused in forward()).
    B, adapt_dim, output_dim = 2, 12, 6
    d_in, d_out = adapt_dim // 3, output_dim // 3

    key = jax.random.PRNGKey(0)
    k_x, k_p, k_x2 = jax.random.split(key, 3)
    adapt_obs = jax.random.normal(k_x, (B, 3, d_in), jnp.float32)
    params = init_params(k_p, d_in, d_out)

    # Exact-semantics check: pure-f32 MXU path vs pure-JAX reference.
    out_f32 = jax.block_until_ready(
        adaptor3d_forward(adapt_obs, params, use_bf16_mxu=False))
    ref_f32 = adaptor3d_ref(adapt_obs, params)
    assert out_f32.shape == (B, output_dim), out_f32.shape
    assert jnp.allclose(out_f32, ref_f32, atol=1e-5, rtol=1e-5), "f32 mismatch"

    # Default path: bf16 MXU operands for the 256->128->64 layers (v6e/v7x win).
    out_bf16 = jax.block_until_ready(
        adaptor3d_forward(adapt_obs, params, use_bf16_mxu=True))
    ref_bf16 = adaptor3d_ref(adapt_obs, params, use_bf16_mxu=True)
    assert jnp.allclose(out_bf16, ref_bf16, atol=1e-3, rtol=1e-3), "bf16 mismatch"
    assert jnp.allclose(out_bf16, ref_f32, atol=5e-2, rtol=5e-2), "bf16 drift vs f32"

    # Larger batch exercises the M-tiling grid (2 tiles of 512) + tail padding.
    B2 = 200
    obs2 = jax.random.normal(k_x2, (B2, 3, d_in), jnp.float32)
    out2 = jax.block_until_ready(
        adaptor3d_forward(obs2, params, use_bf16_mxu=False, tm=512))
    ref2 = adaptor3d_ref(obs2, params)
    assert out2.shape == (B2, output_dim), out2.shape
    assert jnp.allclose(out2, ref2, atol=1e-5, rtol=1e-5), "tiled-path mismatch"

    print("KERNEL_OK")
</pallas_src>

<mosaic_0001>
module attributes {stable_mosaic.version = 11 : i64} {
  func.func @kernel(%arg0: i32, %arg1: memref<4x128xf32, #tpu.memory_space<vmem>>, %arg2: memref<4x256x1xf32, #tpu.memory_space<vmem>>, %arg3: memref<256x1xf32, #tpu.memory_space<vmem>>, %arg4: memref<128x256xf32, #tpu.memory_space<vmem>>, %arg5: memref<128x1xf32, #tpu.memory_space<vmem>>, %arg6: memref<64x128xf32, #tpu.memory_space<vmem>>, %arg7: memref<64x1xf32, #tpu.memory_space<vmem>>, %arg8: memref<2x64xf32, #tpu.memory_space<vmem>>, %arg9: memref<2x1xf32, #tpu.memory_space<vmem>>, %arg10: memref<2x128xf32, #tpu.memory_space<vmem>>) attributes {dimension_semantics = [#tpu.dimension_semantics<parallel>], iteration_bounds = array<i64: 1>, scalar_prefetch = 0 : i64, scratch_operands = 0 : i64, tpu.core_type = #tpu.core_type<tc>, window_params = [{transform_indices = @transform_0, window_bounds = array<i64: 4, 128>}, {pipeline_mode = #tpu.pipeline_mode<synchronous>, transform_indices = @transform_1, window_bounds = array<i64: 4, 256, 1>}, {pipeline_mode = #tpu.pipeline_mode<synchronous>, transform_indices = @transform_2, window_bounds = array<i64: 256, 1>}, {pipeline_mode = #tpu.pipeline_mode<synchronous>, transform_indices = @transform_3, window_bounds = array<i64: 128, 256>}, {pipeline_mode = #tpu.pipeline_mode<synchronous>, transform_indices = @transform_4, window_bounds = array<i64: 128, 1>}, {pipeline_mode = #tpu.pipeline_mode<synchronous>, transform_indices = @transform_5, window_bounds = array<i64: 64, 128>}, {pipeline_mode = #tpu.pipeline_mode<synchronous>, transform_indices = @transform_6, window_bounds = array<i64: 64, 1>}, {pipeline_mode = #tpu.pipeline_mode<synchronous>, transform_indices = @transform_7, window_bounds = array<i64: 2, 64>}, {pipeline_mode = #tpu.pipeline_mode<synchronous>, transform_indices = @transform_8, window_bounds = array<i64: 2, 1>}, {transform_indices = @transform_9, window_bounds = array<i64: 2, 128>}]} {
    %c0 = arith.constant 0 : index
    %c0_0 = arith.constant 0 : index
    %0 = vector.load %arg1[%c0, %c0_0] : memref<4x128xf32, #tpu.memory_space<vmem>>, vector<4x128xf32>
    %cst = arith.constant 0.000000e+00 : f32
    %1 = vector.broadcast %cst : f32 to vector<256x128xf32>
    %c0_1 = arith.constant 0 : index
    %c0_2 = arith.constant 0 : index
    %c0_3 = arith.constant 0 : index
    %2 = vector.load %arg2[%c0_1, %c0_2, %c0_3] : memref<4x256x1xf32, #tpu.memory_space<vmem>>, vector<1x256x1xf32>
    %3 = vector.shape_cast %2 : vector<1x256x1xf32> to vector<256x1xf32>
    %4 = vector.extract_strided_slice %0 {offsets = [0, 0], sizes = [1, 128], strides = [1, 1]} : vector<4x128xf32> to vector<1x128xf32>
    %5 = vector.broadcast %3 : vector<256x1xf32> to vector<256x128xf32>
    %6 = vector.broadcast %4 : vector<1x128xf32> to vector<256x128xf32>
    %7 = arith.mulf %5, %6 : vector<256x128xf32>
    %8 = arith.addf %1, %7 : vector<256x128xf32>
    %c1 = arith.constant 1 : index
    %c0_4 = arith.constant 0 : index
    %c0_5 = arith.constant 0 : index
    %9 = vector.load %arg2[%c1, %c0_4, %c0_5] : memref<4x256x1xf32, #tpu.memory_space<vmem>>, vector<1x256x1xf32>
    %10 = vector.shape_cast %9 : vector<1x256x1xf32> to vector<256x1xf32>
    %11 = vector.extract_strided_slice %0 {offsets = [1, 0], sizes = [1, 128], strides = [1, 1]} : vector<4x128xf32> to vector<1x128xf32>
    %12 = vector.broadcast %10 : vector<256x1xf32> to vector<256x128xf32>
    %13 = vector.broadcast %11 : vector<1x128xf32> to vector<256x128xf32>
    %14 = arith.mulf %12, %13 : vector<256x128xf32>
    %15 = arith.addf %8, %14 : vector<256x128xf32>
    %c2 = arith.constant 2 : index
    %c0_6 = arith.constant 0 : index
    %c0_7 = arith.constant 0 : index
    %16 = vector.load %arg2[%c2, %c0_6, %c0_7] : memref<4x256x1xf32, #tpu.memory_space<vmem>>, vector<1x256x1xf32>
    %17 = vector.shape_cast %16 : vector<1x256x1xf32> to vector<256x1xf32>
    %18 = vector.extract_strided_slice %0 {offsets = [2, 0], sizes = [1, 128], strides = [1, 1]} : vector<4x128xf32> to vector<1x128xf32>
    %19 = vector.broadcast %17 : vector<256x1xf32> to vector<256x128xf32>
    %20 = vector.broadcast %18 : vector<1x128xf32> to vector<256x128xf32>
    %21 = arith.mulf %19, %20 : vector<256x128xf32>
    %22 = arith.addf %15, %21 : vector<256x128xf32>
    %c3 = arith.constant 3 : index
    %c0_8 = arith.constant 0 : index
    %c0_9 = arith.constant 0 : index
    %23 = vector.load %arg2[%c3, %c0_8, %c0_9] : memref<4x256x1xf32, #tpu.memory_space<vmem>>, vector<1x256x1xf32>
    %24 = vector.shape_cast %23 : vector<1x256x1xf32> to vector<256x1xf32>
    %25 = vector.extract_strided_slice %0 {offsets = [3, 0], sizes = [1, 128], strides = [1, 1]} : vector<4x128xf32> to vector<1x128xf32>
    %26 = vector.broadcast %24 : vector<256x1xf32> to vector<256x128xf32>
    %27 = vector.broadcast %25 : vector<1x128xf32> to vector<256x128xf32>
    %28 = arith.mulf %26, %27 : vector<256x128xf32>
    %29 = arith.addf %22, %28 : vector<256x128xf32>
    %c0_10 = arith.constant 0 : index
    %c0_11 = arith.constant 0 : index
    %30 = vector.load %arg3[%c0_10, %c0_11] : memref<256x1xf32, #tpu.memory_space<vmem>>, vector<256x1xf32>
    %31 = vector.broadcast %30 : vector<256x1xf32> to vector<256x128xf32>
    %32 = arith.addf %29, %31 : vector<256x128xf32>
    %cst_12 = arith.constant 0.000000e+00 : f32
    %33 = vector.broadcast %cst_12 : f32 to vector<256x128xf32>
    %34 = arith.maximumf %32, %33 : vector<256x128xf32>
    %c0_13 = arith.constant 0 : index
    %c0_14 = arith.constant 0 : index
    %35 = vector.load %arg4[%c0_13, %c0_14] : memref<128x256xf32, #tpu.memory_space<vmem>>, vector<128x256xf32>
    %cst_15 = arith.constant dense<0.000000e+00> : vector<128x128xf32>
    %36 = tpu.matmul %35, %34, %cst_15 {dimension_numbers = #tpu.dot_dimension_numbers<[1], [0], [0], [1], [0, 0, 1, 1], [], []>} : vector<128x256xf32>, vector<256x128xf32>, vector<128x128xf32> -> vector<128x128xf32>
    %c0_16 = arith.constant 0 : index
    %c0_17 = arith.constant 0 : index
    %37 = vector.load %arg5[%c0_16, %c0_17] : memref<128x1xf32, #tpu.memory_space<vmem>>, vector<128x1xf32>
    %38 = vector.broadcast %37 : vector<128x1xf32> to vector<128x128xf32>
    %39 = arith.addf %36, %38 : vector<128x128xf32>
    %cst_18 = arith.constant 0.000000e+00 : f32
    %40 = vector.broadcast %cst_18 : f32 to vector<128x128xf32>
    %41 = arith.maximumf %39, %40 : vector<128x128xf32>
    %c0_19 = arith.constant 0 : index
    %c0_20 = arith.constant 0 : index
    %42 = vector.load %arg6[%c0_19, %c0_20] : memref<64x128xf32, #tpu.memory_space<vmem>>, vector<64x128xf32>
    %cst_21 = arith.constant dense<0.000000e+00> : vector<64x128xf32>
    %43 = tpu.matmul %42, %41, %cst_21 {dimension_numbers = #tpu.dot_dimension_numbers<[1], [0], [0], [1], [0, 0, 1, 1], [], []>} : vector<64x128xf32>, vector<128x128xf32>, vector<64x128xf32> -> vector<64x128xf32>
    %c0_22 = arith.constant 0 : index
    %c0_23 = arith.constant 0 : index
    %44 = vector.load %arg7[%c0_22, %c0_23] : memref<64x1xf32, #tpu.memory_space<vmem>>, vector<64x1xf32>
    %45 = vector.broadcast %44 : vector<64x1xf32> to vector<64x128xf32>
    %46 = arith.addf %43, %45 : vector<64x128xf32>
    %cst_24 = arith.constant 0.000000e+00 : f32
    %47 = vector.broadcast %cst_24 : f32 to vector<64x128xf32>
    %48 = arith.maximumf %46, %47 : vector<64x128xf32>
    %c0_25 = arith.constant 0 : index
    %c0_26 = arith.constant 0 : index
    %49 = vector.load %arg8[%c0_25, %c0_26] : memref<2x64xf32, #tpu.memory_space<vmem>>, vector<2x64xf32>
    %cst_27 = arith.constant dense<0.000000e+00> : vector<2x128xf32>
    %50 = tpu.matmul %49, %48, %cst_27 {dimension_numbers = #tpu.dot_dimension_numbers<[1], [0], [0], [1], [0, 0, 1, 1], [], []>} : vector<2x64xf32>, vector<64x128xf32>, vector<2x128xf32> -> vector<2x128xf32>
    %c0_28 = arith.constant 0 : index
    %c0_29 = arith.constant 0 : index
    %51 = vector.load %arg9[%c0_28, %c0_29] : memref<2x1xf32, #tpu.memory_space<vmem>>, vector<2x1xf32>
    %52 = vector.broadcast %51 : vector<2x1xf32> to vector<2x128xf32>
    %53 = arith.addf %50, %52 : vector<2x128xf32>
    %54 = math.tanh %53 : vector<2x128xf32>
    %cst_30 = arith.constant 2.000000e+00 : f32
    %55 = vector.broadcast %cst_30 : f32 to vector<2x128xf32>
    %56 = arith.mulf %54, %55 : vector<2x128xf32>
    %c0_31 = arith.constant 0 : index
    %c0_32 = arith.constant 0 : index
    %57 = vector.load %arg10[%c0_31, %c0_32] : memref<2x128xf32, #tpu.memory_space<vmem>>, vector<2x128xf32>
    tpu.vector_store %arg10[%c0_31, %c0_32], %56 {strides = array<i32>} : memref<2x128xf32, #tpu.memory_space<vmem>>, vector<2x128xf32>,
    return
  }
  func.func @transform_0(%arg0: i32) -> (i32, i32) {
    %c0_i32 = arith.constant 0 : i32
    %c0_i32_0 = arith.constant 0 : i32
    return %c0_i32, %arg0 : i32, i32
  }
  func.func @transform_1(%arg0: i32) -> (i32, i32, i32) {
    %c0_i32 = arith.constant 0 : i32
    %c0_i32_0 = arith.constant 0 : i32
    %c0_i32_1 = arith.constant 0 : i32
    %c0_i32_2 = arith.constant 0 : i32
    return %c0_i32, %c0_i32_0, %c0_i32_1 : i32, i32, i32
  }
  func.func @transform_2(%arg0: i32) -> (i32, i32) {
    %c0_i32 = arith.constant 0 : i32
    %c0_i32_0 = arith.constant 0 : i32
    %c0_i32_1 = arith.constant 0 : i32
    return %c0_i32, %c0_i32_0 : i32, i32
  }
  func.func @transform_3(%arg0: i32) -> (i32, i32) {
    %c0_i32 = arith.constant 0 : i32
    %c0_i32_0 = arith.constant 0 : i32
    %c0_i32_1 = arith.constant 0 : i32
    return %c0_i32, %c0_i32_0 : i32, i32
  }
  func.func @transform_4(%arg0: i32) -> (i32, i32) {
    %c0_i32 = arith.constant 0 : i32
    %c0_i32_0 = arith.constant 0 : i32
    %c0_i32_1 = arith.constant 0 : i32
    return %c0_i32, %c0_i32_0 : i32, i32
  }
  func.func @transform_5(%arg0: i32) -> (i32, i32) {
    %c0_i32 = arith.constant 0 : i32
    %c0_i32_0 = arith.constant 0 : i32
    %c0_i32_1 = arith.constant 0 : i32
    return %c0_i32, %c0_i32_0 : i32, i32
  }
  func.func @transform_6(%arg0: i32) -> (i32, i32) {
    %c0_i32 = arith.constant 0 : i32
    %c0_i32_0 = arith.constant 0 : i32
    %c0_i32_1 = arith.constant 0 : i32
    return %c0_i32, %c0_i32_0 : i32, i32
  }
  func.func @transform_7(%arg0: i32) -> (i32, i32) {
    %c0_i32 = arith.constant 0 : i32
    %c0_i32_0 = arith.constant 0 : i32
    %c0_i32_1 = arith.constant 0 : i32
    return %c0_i32, %c0_i32_0 : i32, i32
  }
  func.func @transform_8(%arg0: i32) -> (i32, i32) {
    %c0_i32 = arith.constant 0 : i32
    %c0_i32_0 = arith.constant 0 : i32
    %c0_i32_1 = arith.constant 0 : i32
    return %c0_i32, %c0_i32_0 : i32, i32
  }
  func.func @transform_9(%arg0: i32) -> (i32, i32) {
    %c0_i32 = arith.constant 0 : i32
    %c0_i32_0 = arith.constant 0 : i32
    return %c0_i32, %arg0 : i32, i32
  }
}

</mosaic_0001>

<bundles_post_ra>
// kernel: tpu_custom_call.1
= control target key start
LH: loop header
LB: loop body
LE: loop exit
PB: predicated region body
PF: predicated region fallthrough
CT: control target
= control target key end

     0   :  { %v2271_v2 = vmov 0   ;;  %s3434_s0 = inlined_call_operand.vmem [shape: f32[4,128], index: 0, kind: input, shape index: {}]   ;;  %s3435_s1 = inlined_call_operand.vmem [shape: f32[4,256,1], index: 1, kind: input, shape index: {}]   ;;  %s3436_s2 = inlined_call_operand.vmem [shape: f32[256,1], index: 2, kind: input, shape index: {}]   ;;  %s3437_s3 = inlined_call_operand.vmem [shape: f32[128,256], index: 3, kind: input, shape index: {}]   ;;  %s3438_s4 = inlined_call_operand.vmem [shape: f32[128,1], index: 4, kind: input, shape index: {}]   ;;  %s3439_s5 = inlined_call_operand.vmem [shape: f32[64,128], index: 5, kind: input, shape index: {}]   ;;  %s3440_s6 = inlined_call_operand.vmem [shape: f32[64,1], index: 6, kind: input, shape index: {}]   ;;  %s3441_s7 = inlined_call_operand.vmem [shape: f32[2,64], index: 7, kind: input, shape index: {}]   ;;  %s3442_s8 = inlined_call_operand.vmem [shape: f32[2,1], index: 8, kind: input, shape index: {}]   ;;  %s3443_s9 = inlined_call_operand.hbm [shape: f32[2,128], index: 9, kind: output, shape index: {}]  }
   0x1   :  { %v1905_v0 = vld [vmem:[%s3435_s1 + $0x180] sm:$0xff]  ;;  %2244 = vset.pattern.permute.xlu1 %v2271_v2  ;;  %2243 = vset.pattern.permute.xlu0 %v2271_v2  ;;  %v1906_v3 = vld [vmem:[%s3435_s1 + $0x188] sm:$0xff]  ;;  %v53_v13 = vld [vmem:[%s3435_s1 + $0x98] sm:$0xff] }
   0x2   :  { %v50_v1 = vld [vmem:[%s3435_s1 + $0x80] sm:$0xff]  ;;  %409 = vperm.xlu1 %2244, %v1905_v0   ;;  %v51_v4 = vld [vmem:[%s3435_s1 + $0x88] sm:$0xff]  ;;  %v52_v14 = vld [vmem:[%s3435_s1 + $0x90] sm:$0xff] }
   0x3   :  { %148 = vperm.xlu0 %2243, %v50_v1   ;;  %v35_v5 = vld [vmem:[%s3435_s1 + $0x8] sm:$0xff]  ;;  %v34_v6 = vld [vmem:[%s3435_s1] sm:$0xff] }
   0x4   :  { %v1890_v7 = vld [vmem:[%s3435_s1 + $0x108] sm:$0xff]  ;;  %v1889_v8 = vld [vmem:[%s3435_s1 + $0x100] sm:$0xff] }
   0x5   :  { %v1938_v9 = vld [vmem:[%s3435_s1 + $0x288] sm:$0xff]  ;;  %v1937_v10 = vld [vmem:[%s3435_s1 + $0x280] sm:$0xff] }
   0x6   :  { %414 = vperm.xlu1 %2244, %v1906_v3   ;;  %v1922_v11 = vld [vmem:[%s3435_s1 + $0x208] sm:$0xff]  ;;  %v1921_v12 = vld [vmem:[%s3435_s1 + $0x200] sm:$0xff] }
   0x7   :  { %153 = vperm.xlu0 %2243, %v51_v4  }
   0xa   :  { %73 = vperm.xlu1 %2244, %v35_v5  }
   0xb   :  { %68 = vperm.xlu0 %2243, %v34_v6  }
   0xe   :  { %334 = vperm.xlu1 %2244, %v1890_v7  }
   0xf   :  { %329 = vperm.xlu0 %2243, %v1889_v8  }
  0x12   :  { %675 = vperm.xlu1 %2244, %v1938_v9  }
  0x13   :  { %670 = vperm.xlu0 %2243, %v1937_v10  }
  0x16   :  { %595 = vperm.xlu1 %2244, %v1922_v11  }
  0x17   :  { %590 = vperm.xlu0 %2243, %v1921_v12  }
  0x1a   :  { %163 = vperm.xlu1 %2244, %v53_v13  }
  0x1b   :  { %158 = vperm.xlu0 %2243, %v52_v14  }
  0x1c   :  { %14 = vsyncpa [#allocation3], 0  ;;  %v1908_v15 = vld [vmem:[%s3435_s1 + $0x198] sm:$0xff]  ;;  %v1907_v16 = vld [vmem:[%s3435_s1 + $0x190] sm:$0xff]  ;;  %vm2273_vm0 = vmmov 0   ;;  %vm1798_vm1 = vcmask 523264  }
  0x1d   :  { %v1970_v17 = vld [vmem:[%s3435_s1 + $0x388] sm:$0xff]  ;;  %v1969_v18 = vld [vmem:[%s3435_s1 + $0x380] sm:$0xff]  ;;  %v37_v19 = vld [vmem:[%s3435_s1 + $0x18] sm:$0xff]  ;;  %s2275_s30 = smov [#allocation2]  }
  0x1e   :  { %424 = vperm.xlu1 %2244, %v1908_v15   ;;  %v36_v20 = vld [vmem:[%s3435_s1 + $0x10] sm:$0xff]  ;;  %v1892_v21 = vld [vmem:[%s3435_s1 + $0x118] sm:$0xff]  ;;  %v1954_v23 = vld [vmem:[%s3435_s1 + $0x308] sm:$0xff] }
  0x1f   :  { %419 = vperm.xlu0 %2243, %v1907_v16   ;;  %v1891_v22 = vld [vmem:[%s3435_s1 + $0x110] sm:$0xff]  ;;  %v1953_v24 = vld [vmem:[%s3435_s1 + $0x300] sm:$0xff]  ;;  %v1940_v25 = vld [vmem:[%s3435_s1 + $0x298] sm:$0xff] }
  0x20   :  { %v1939_v26 = vld [vmem:[%s3435_s1 + $0x290] sm:$0xff]  ;;  %v1924_v27 = vld [vmem:[%s3435_s1 + $0x218] sm:$0xff]  ;;  %v55_v29 = vld [vmem:[%s3435_s1 + $0xa8] sm:$0xff] }
  0x21   :  { %v1923_v28 = vld [vmem:[%s3435_s1 + $0x210] sm:$0xff]  ;;  %v54_v30 = vld [vmem:[%s3435_s1 + $0xa0] sm:$0xff]  ;;  %v1910_v31 = vld [vmem:[%s3435_s1 + $0x1a8] sm:$0xff] }
  0x22   :  { %936 = vperm.xlu1 %2244, %v1970_v17   ;;  %v1909_v32 = vld [vmem:[%s3435_s1 + $0x1a0] sm:$0xff]  ;;  %v1972_v33 = vld [vmem:[%s3435_s1 + $0x398] sm:$0xff]  ;;  %v1971_v34 = vld [vmem:[%s3435_s1 + $0x390] sm:$0xff] }
  0x23   :  { %931 = vperm.xlu0 %2243, %v1969_v18   ;;  %v1094_v35 = vld [vmem:[%s3436_s2 + $0x88] sm:$0xff]  ;;  %v1093_v36 = vld [vmem:[%s3436_s2 + $0x80] sm:$0xff]  ;;  %v1956_v41 = vld [vmem:[%s3435_s1 + $0x318] sm:$0xff] }
  0x24   :  { %v39_v37 = vld [vmem:[%s3435_s1 + $0x28] sm:$0xff]  ;;  %v38_v38 = vld [vmem:[%s3435_s1 + $0x20] sm:$0xff]  ;;  %v1955_v42 = vld [vmem:[%s3435_s1 + $0x310] sm:$0xff] }
  0x25   :  { %v1894_v39 = vld [vmem:[%s3435_s1 + $0x128] sm:$0xff]  ;;  %v1893_v40 = vld [vmem:[%s3435_s1 + $0x120] sm:$0xff]  ;;  %v57_v49 = vld [vmem:[%s3435_s1 + $0xb8] sm:$0xff] }
  0x26   :  { %83 = vperm.xlu1 %2244, %v37_v19   ;;  %v1078_v43 = vld [vmem:[%s3436_s2 + $0x8] sm:$0xff]  ;;  %v1077_v44 = vld [vmem:[%s3436_s2] sm:$0xff]  ;;  %v56_v50 = vld [vmem:[%s3435_s1 + $0xb0] sm:$0xff] }
  0x27   :  { %78 = vperm.xlu0 %2243, %v36_v20   ;;  %v1942_v45 = vld [vmem:[%s3435_s1 + $0x2a8] sm:$0xff]  ;;  %v1941_v46 = vld [vmem:[%s3435_s1 + $0x2a0] sm:$0xff]  ;;  %v1912_v51 = vld [vmem:[%s3435_s1 + $0x1b8] sm:$0xff] }
  0x28   :  { %v1926_v47 = vld [vmem:[%s3435_s1 + $0x228] sm:$0xff]  ;;  %v1925_v48 = vld [vmem:[%s3435_s1 + $0x220] sm:$0xff]  ;;  %v1911_v52 = vld [vmem:[%s3435_s1 + $0x1b0] sm:$0xff] }
  0x29   :  { %v1974_v53 = vld [vmem:[%s3435_s1 + $0x3a8] sm:$0xff]  ;;  %v1973_v54 = vld [vmem:[%s3435_s1 + $0x3a0] sm:$0xff]  ;;  %v1096_v55 = vld [vmem:[%s3436_s2 + $0x98] sm:$0xff] }
  0x2a   :  { %344 = vperm.xlu1 %2244, %v1892_v21   ;;  %v1095_v56 = vld [vmem:[%s3436_s2 + $0x90] sm:$0xff]  ;;  %v41_v57 = vld [vmem:[%s3435_s1 + $0x38] sm:$0xff]  ;;  %v1958_v61 = vld [vmem:[%s3435_s1 + $0x328] sm:$0xff] }
  0x2b   :  { %339 = vperm.xlu0 %2243, %v1891_v22   ;;  %v40_v58 = vld [vmem:[%s3435_s1 + $0x30] sm:$0xff]  ;;  %v1896_v59 = vld [vmem:[%s3435_s1 + $0x138] sm:$0xff]  ;;  %v1957_v62 = vld [vmem:[%s3435_s1 + $0x320] sm:$0xff] }
  0x2c   :  { %v1895_v60 = vld [vmem:[%s3435_s1 + $0x130] sm:$0xff]  ;;  %v1080_v63 = vld [vmem:[%s3436_s2 + $0x18] sm:$0xff]  ;;  %v59_v9 = vld [vmem:[%s3435_s1 + $0xc8] sm:$0xff] }
  0x2d   :  { %v1079_v0 = vld [vmem:[%s3436_s2 + $0x10] sm:$0xff]  ;;  %v1944_v1 = vld [vmem:[%s3435_s1 + $0x2b8] sm:$0xff]  ;;  %v58_v10 = vld [vmem:[%s3435_s1 + $0xc0] sm:$0xff] }
  0x2e   :  { %856 = vperm.xlu1 %2244, %v1954_v23   ;;  %v1943_v2 = vld [vmem:[%s3435_s1 + $0x2b0] sm:$0xff]  ;;  %v1928_v5 = vld [vmem:[%s3435_s1 + $0x238] sm:$0xff]  ;;  %v1914_v13 = vld [vmem:[%s3435_s1 + $0x1c8] sm:$0xff] }
  0x2f   :  { %851 = vperm.xlu0 %2243, %v1953_v24   ;;  %v1927_v6 = vld [vmem:[%s3435_s1 + $0x230] sm:$0xff]  ;;  %v1913_v14 = vld [vmem:[%s3435_s1 + $0x1c0] sm:$0xff]  ;;  %v1976_v17 = vld [vmem:[%s3435_s1 + $0x3b8] sm:$0xff] }
  0x30   :  { %v1975_v18 = vld [vmem:[%s3435_s1 + $0x3b0] sm:$0xff]  ;;  %v1098_v21 = vld [vmem:[%s3436_s2 + $0xa8] sm:$0xff]  ;;  %v1097_v22 = vld [vmem:[%s3436_s2 + $0xa0] sm:$0xff] }
  0x32   :  { %685 = vperm.xlu1 %2244, %v1940_v25   ;;  %v43_v25 = vld [vmem:[%s3435_s1 + $0x48] sm:$0xff] }
  0x33   :  { %680 = vperm.xlu0 %2243, %v1939_v26   ;;  %v42_v26 = vld [vmem:[%s3435_s1 + $0x40] sm:$0xff] }
  0x36   :  { %605 = vperm.xlu1 %2244, %v1924_v27  }
  0x37   :  { %600 = vperm.xlu0 %2243, %v1923_v28  }
  0x3a   :  { %173 = vperm.xlu1 %2244, %v55_v29   ;;  %v1898_v29 = vld [vmem:[%s3435_s1 + $0x148] sm:$0xff] }
  0x3b   :  { %168 = vperm.xlu0 %2243, %v54_v30   ;;  %v1897_v30 = vld [vmem:[%s3435_s1 + $0x140] sm:$0xff] }
  0x3e   :  { %434 = vperm.xlu1 %2244, %v1910_v31  }
  0x3f   :  { %429 = vperm.xlu0 %2243, %v1909_v32  }
  0x42   :  { %946 = vperm.xlu1 %2244, %v1972_v33   ;;  %v1960_v33 = vld [vmem:[%s3435_s1 + $0x338] sm:$0xff] }
  0x43   :  { %941 = vperm.xlu0 %2243, %v1971_v34   ;;  %v1959_v34 = vld [vmem:[%s3435_s1 + $0x330] sm:$0xff] }
  0x46   :  { %1196 = vperm.xlu1 %2244, %v1094_v35  }
  0x47   :  { %1191 = vperm.xlu0 %2243, %v1093_v36  }
  0x4a   :  { %93 = vperm.xlu1 %2244, %v39_v37   ;;  %v1082_v37 = vld [vmem:[%s3436_s2 + $0x28] sm:$0xff] }
  0x4b   :  { %88 = vperm.xlu0 %2243, %v38_v38   ;;  %v1081_v38 = vld [vmem:[%s3436_s2 + $0x20] sm:$0xff] }
  0x4e   :  { %354 = vperm.xlu1 %2244, %v1894_v39  }
  0x4f   :  { %349 = vperm.xlu0 %2243, %v1893_v40  }
  0x52   :  { %866 = vperm.xlu1 %2244, %v1956_v41   ;;  %v1946_v41 = vld [vmem:[%s3435_s1 + $0x2c8] sm:$0xff] }
  0x53   :  { %861 = vperm.xlu0 %2243, %v1955_v42   ;;  %v1945_v42 = vld [vmem:[%s3435_s1 + $0x2c0] sm:$0xff] }
  0x56   :  { %1116 = vperm.xlu1 %2244, %v1078_v43  }
  0x57   :  { %1111 = vperm.xlu0 %2243, %v1077_v44  }
  0x5a   :  { %695 = vperm.xlu1 %2244, %v1942_v45   ;;  %v1930_v45 = vld [vmem:[%s3435_s1 + $0x248] sm:$0xff] }
  0x5b   :  { %690 = vperm.xlu0 %2243, %v1941_v46   ;;  %v1929_v46 = vld [vmem:[%s3435_s1 + $0x240] sm:$0xff] }
  0x5e   :  { %615 = vperm.xlu1 %2244, %v1926_v47   ;;  %v226_v47 = vlaneseq }
  0x5f   :  { %610 = vperm.xlu0 %2243, %v1925_v48  }
  0x62   :  { %183 = vperm.xlu1 %2244, %v57_v49  }
  0x63   :  { %178 = vperm.xlu0 %2243, %v56_v50   ;;  %v61_v50 = vld [vmem:[%s3435_s1 + $0xd8] sm:$0xff] }
  0x66   :  { %444 = vperm.xlu1 %2244, %v1912_v51   ;;  %v60_v51 = vld [vmem:[%s3435_s1 + $0xd0] sm:$0xff] }
  0x67   :  { %439 = vperm.xlu0 %2243, %v1911_v52   ;;  %v227_v52 = vshrl.u32 %v226_v47, 7 }
  0x6a   :  { %956 = vperm.xlu1 %2244, %v1974_v53  }
  0x6b   :  { %951 = vperm.xlu0 %2243, %v1973_v54  }
  0x6e   :  { %1206 = vperm.xlu1 %2244, %v1096_v55   ;;  %v1916_v55 = vld [vmem:[%s3435_s1 + $0x1d8] sm:$0xff] }
  0x6f   :  { %1201 = vperm.xlu0 %2243, %v1095_v56   ;;  %v1915_v56 = vld [vmem:[%s3435_s1 + $0x1d0] sm:$0xff] }
  0x72   :  { %103 = vperm.xlu1 %2244, %v41_v57   ;;  %v489_v57 = vsub.s32 1, %v227_v52 }
  0x73   :  { %98 = vperm.xlu0 %2243, %v40_v58   ;;  %v228_v58 = vsub.s32 0, %v227_v52 }
  0x76   :  { %364 = vperm.xlu1 %2244, %v1896_v59   ;;  %v33_v59 = vld [vmem:[%s3434_s0] sm:$0xf] }
  0x77   :  { %359 = vperm.xlu0 %2243, %v1895_v60  }
  0x7a   :  { %876 = vperm.xlu1 %2244, %v1958_v61  }
  0x7b   :  { %871 = vperm.xlu0 %2243, %v1957_v62   ;;  %v750_v62 = vsub.s32 2, %v227_v52 }
  0x7e   :  { %1126 = vperm.xlu1 %2244, %v1080_v63   ;;  %v1011_v63 = vsub.s32 3, %v227_v52  ;;  %v1962_v52 = vld [vmem:[%s3435_s1 + $0x348] sm:$0xff] }
  0x7f   :  { %1121 = vperm.xlu0 %2243, %v1079_v0   ;;  %v1978_v0 = vld [vmem:[%s3435_s1 + $0x3c8] sm:$0xff] }
  0x81   :  { %v2524_v3 = vpop.permute.xlu1 %409 }
  0x82   :  { %v2526_v4 = vpop.permute.xlu0 %148  ;;  %705 = vperm.xlu1 %2244, %v1944_v1   ;;  %v1977_v1 = vld [vmem:[%s3435_s1 + $0x3c0] sm:$0xff] }
  0x83   :  { %700 = vperm.xlu0 %2243, %v1943_v2   ;;  %v2667_v2 = vrot.slane %v33_v59, %v489_v57 }
  0x85   :  { %v2534_v7 = vpop.permute.xlu1 %414 }
  0x86   :  { %v2536_v8 = vpop.permute.xlu0 %153  ;;  %625 = vperm.xlu1 %2244, %v1928_v5   ;;  %v2669_v5 = vrot.slane %v33_v59, %v228_v58 }
  0x87   :  { %620 = vperm.xlu0 %2243, %v1927_v6  }
  0x89   :  { %v2544_v11 = vpop.permute.xlu1 %73 }
  0x8a   :  { %v2546_v12 = vpop.permute.xlu0 %68  ;;  %193 = vperm.xlu1 %2244, %v59_v9  }
  0x8b   :  { %188 = vperm.xlu0 %2243, %v58_v10   ;;  %v2675_v10 = vrot.slane %v33_v59, %v750_v62 }
  0x8d   :  { %v2554_v15 = vpop.permute.xlu1 %334 }
  0x8e   :  { %v2556_v16 = vpop.permute.xlu0 %329  ;;  %454 = vperm.xlu1 %2244, %v1914_v13   ;;  %v2677_v13 = vrot.slane %v33_v59, %v1011_v63  ;;  %v1084_v63 = vld [vmem:[%s3436_s2 + $0x38] sm:$0xff] }
  0x8f   :  { %449 = vperm.xlu0 %2243, %v1913_v14   ;;  %v1100_v14 = vld [vmem:[%s3436_s2 + $0xb8] sm:$0xff] }
  0x91   :  { %v2564_v19 = vpop.permute.xlu1 %675 }
  0x92   :  { %v2566_v20 = vpop.permute.xlu0 %670  ;;  %966 = vperm.xlu1 %2244, %v1976_v17   ;;  %v1099_v17 = vld [vmem:[%s3436_s2 + $0xb0] sm:$0xff] }
  0x93   :  { %961 = vperm.xlu0 %2243, %v1975_v18   ;;  %v507_v18 = vmul.f32 %v2667_v2, %v2524_v3  ;;  %v45_v3 = vld [vmem:[%s3435_s1 + $0x58] sm:$0xff] }
  0x95   :  { %v2574_v23 = vpop.permute.xlu1 %595 }
  0x96   :  { %v2576_v24 = vpop.permute.xlu0 %590  ;;  %1216 = vperm.xlu1 %2244, %v1098_v21   ;;  %v246_v21 = vmul.f32 %v2669_v5, %v2526_v4  ;;  %v44_v4 = vld [vmem:[%s3435_s1 + $0x50] sm:$0xff] }
  0x97   :  { %1211 = vperm.xlu0 %2243, %v1097_v22   ;;  %v508_v22 = vmul.f32 %v2667_v2, %v2534_v7 }
  0x98   :  { %v539_v7 = vadd.f32 %v507_v18, %v246_v21 }
  0x99   :  { %v2584_v27 = vpop.permute.xlu1 %163 }
  0x9a   :  { %v2586_v28 = vpop.permute.xlu0 %158  ;;  %113 = vperm.xlu1 %2244, %v43_v25   ;;  %v247_v25 = vmul.f32 %v2669_v5, %v2536_v8 }
  0x9b   :  { %108 = vperm.xlu0 %2243, %v42_v26  }
  0x9c   :  { %v540_v8 = vadd.f32 %v508_v22, %v247_v25  ;;  %v230_v22 = vmul.f32 %v2669_v5, %v2546_v12  ;;  %v753_v25 = vmul.f32 %v2675_v10, %v2574_v23 }
  0x9d   :  { %v2594_v31 = vpop.permute.xlu1 %424 }
  0x9e   :  { %v2596_v32 = vpop.permute.xlu0 %419  ;;  %374 = vperm.xlu1 %2244, %v1898_v29  }
  0x9f   :  { %369 = vperm.xlu0 %2243, %v1897_v30   ;;  %v769_v30 = vmul.f32 %v2675_v10, %v2564_v19 }
  0xa1   :  { %v2604_v35 = vpop.permute.xlu1 %936 }
  0xa2   :  { %v2606_v36 = vpop.permute.xlu0 %931  ;;  %886 = vperm.xlu1 %2244, %v1960_v33   ;;  %v768_v33 = vmul.f32 %v2675_v10, %v2566_v20 }
  0xa3   :  { %881 = vperm.xlu0 %2243, %v1959_v34   ;;  %v1030_v34 = vmul.f32 %v2677_v13, %v2604_v35  ;;  %v1029_v19 = vmul.f32 %v2677_v13, %v2606_v36 }
  0xa5   :  { %v2614_v39 = vpop.permute.xlu1 %83 }
  0xa6   :  { %v2616_v40 = vpop.permute.xlu0 %78  ;;  %1136 = vperm.xlu1 %2244, %v1082_v37  }
  0xa7   :  { %1131 = vperm.xlu0 %2243, %v1081_v38   ;;  %v801_v38 = vadd.f32 %v769_v30, %v540_v8  ;;  %v1932_v8 = vld [vmem:[%s3435_s1 + $0x258] sm:$0xff] }
  0xa9   :  { %v2624_v43 = vpop.permute.xlu1 %344  ;;  %v1062_v35 = vadd.f32 %v1030_v34, %v801_v38  ;;  %v1931_v34 = vld [vmem:[%s3435_s1 + $0x250] sm:$0xff] }
  0xaa   :  { %v2626_v44 = vpop.permute.xlu0 %339  ;;  %715 = vperm.xlu1 %2244, %v1946_v41   ;;  %v800_v41 = vadd.f32 %v768_v33, %v539_v7 }
  0xab   :  { %710 = vperm.xlu0 %2243, %v1945_v42   ;;  %v1900_v42 = vld [vmem:[%s3435_s1 + $0x158] sm:$0xff] }
  0xad   :  { %v2634_v48 = vpop.permute.xlu1 %856 }
  0xae   :  { %v2636_v49 = vpop.permute.xlu0 %851  ;;  %635 = vperm.xlu1 %2244, %v1930_v45   ;;  %v1899_v45 = vld [vmem:[%s3435_s1 + $0x150] sm:$0xff]  ;;  %v1014_v12 = vmul.f32 %v2677_v13, %v2634_v48 }
  0xaf   :  { %630 = vperm.xlu0 %2243, %v1929_v46   ;;  %v1061_v46 = vadd.f32 %v1029_v19, %v800_v41  ;;  %v1013_v23 = vmul.f32 %v2677_v13, %v2636_v49 }
  0xb1   :  { %v2644_v53 = vpop.permute.xlu1 %685 }
  0xb2   :  { %v2646_v54 = vpop.permute.xlu0 %680  ;;  %203 = vperm.xlu1 %2244, %v61_v50  }
  0xb3   :  { %198 = vperm.xlu0 %2243, %v60_v51  }
  0xb5   :  { %v2657_v60 = vpop.permute.xlu1 %605 }
  0xb6   :  { %v2659_v61 = vpop.permute.xlu0 %600  ;;  %464 = vperm.xlu1 %2244, %v1916_v55   ;;  %v1961_v55 = vld [vmem:[%s3435_s1 + $0x340] sm:$0xff] }
  0xb7   :  { %459 = vperm.xlu0 %2243, %v1915_v56  }
  0xb9   :  { %v2671_v6 = vpop.permute.xlu1 %173 }
  0xba   :  { %v2673_v9 = vpop.permute.xlu0 %168  ;;  %976 = vperm.xlu1 %2244, %v1978_v0   ;;  %v1083_v0 = vld [vmem:[%s3436_s2 + $0x30] sm:$0xff] }
  0xbb   :  { %971 = vperm.xlu0 %2243, %v1977_v1   ;;  %v492_v1 = vmul.f32 %v2667_v2, %v2554_v15  ;;  %v752_v15 = vmul.f32 %v2675_v10, %v2576_v24 }
  0xbd   :  { %v2693_v26 = vpop.permute.xlu1 %434 }
  0xbe   :  { %v2695_v29 = vpop.permute.xlu0 %429  ;;  %1226 = vperm.xlu1 %2244, %v1100_v14   ;;  %v491_v14 = vmul.f32 %v2667_v2, %v2556_v16  ;;  %v1948_v16 = vld [vmem:[%s3435_s1 + $0x2d8] sm:$0xff] }
  0xbf   :  { %1221 = vperm.xlu0 %2243, %v1099_v17   ;;  %v231_v17 = vmul.f32 %v2669_v5, %v2544_v11  ;;  %v1947_v11 = vld [vmem:[%s3435_s1 + $0x2d0] sm:$0xff] }
  0xc0   :  { %v523_v33 = vadd.f32 %v491_v14, %v230_v22  ;;  %v1102_v14 = vld [vmem:[%s3436_s2 + $0xc8] sm:$0xff]  ;;  %v510_v22 = vmul.f32 %v2667_v2, %v2594_v31 }
  0xc1   :  { %v2711_v37 = vpop.permute.xlu1 %946  ;;  %v524_v30 = vadd.f32 %v492_v1, %v231_v17  ;;  %v1101_v17 = vld [vmem:[%s3436_s2 + $0xc0] sm:$0xff]  ;;  %v47_v31 = vld [vmem:[%s3435_s1 + $0x68] sm:$0xff] }
  0xc2   :  { %v2713_v20 = vpop.permute.xlu0 %941  ;;  %123 = vperm.xlu1 %2244, %v45_v3   ;;  %v784_v7 = vadd.f32 %v752_v15, %v523_v33  ;;  %v249_v15 = vmul.f32 %v2669_v5, %v2584_v27  ;;  %v771_v33 = vmul.f32 %v2675_v10, %v2644_v53  ;;  %v46_v27 = vld [vmem:[%s3435_s1 + $0x60] sm:$0xff] }
  0xc3   :  { %118 = vperm.xlu0 %2243, %v44_v4   ;;  %v785_v4 = vadd.f32 %v753_v25, %v524_v30  ;;  %v509_v25 = vmul.f32 %v2667_v2, %v2596_v32  ;;  %v248_v30 = vmul.f32 %v2669_v5, %v2586_v28  ;;  %v1032_v28 = vmul.f32 %v2677_v13, %v2711_v37 }
  0xc4   :  { %v1045_v19 = vadd.f32 %v1013_v23, %v784_v7  ;;  %v542_v32 = vadd.f32 %v510_v22, %v249_v15  ;;  %v1031_v53 = vmul.f32 %v2677_v13, %v2713_v20  ;;  %v232_v15 = vmul.f32 %v2669_v5, %v2616_v40 }
  0xc5   :  { %v1197_v47 = vpop.permute.xlu1 %1196  ;;  %v1046_v48 = vadd.f32 %v1014_v12, %v785_v4  ;;  %v770_v12 = vmul.f32 %v2675_v10, %v2646_v54  ;;  %v541_v23 = vadd.f32 %v509_v25, %v248_v30  ;;  %v755_v30 = vmul.f32 %v2675_v10, %v2657_v60 }
  0xc6   :  { %v1192_v36 = vpop.permute.xlu0 %1191  ;;  %v1286_v50 = vadd.f32 %v1197_v47, %v1062_v35  ;;  %384 = vperm.xlu1 %2244, %v1900_v42   ;;  %v62_v35 = vld [vmem:[%s3435_s1 + $0xe0] sm:$0xff]  ;;  %v803_v7 = vadd.f32 %v771_v33, %v542_v32 }
  0xc7   :  { %v1285_v51 = vadd.f32 %v1192_v36, %v1061_v46  ;;  %379 = vperm.xlu0 %2243, %v1899_v45   ;;  %v63_v45 = vld [vmem:[%s3435_s1 + $0xe8] sm:$0xff] }
  0xc8   :  { %v1318_v57 = vmax.f32 %v1286_v50, 0.0  ;;  %v1064_v37 = vadd.f32 %v1032_v28, %v803_v7  ;;  %v1933_v28 = vld [vmem:[%s3435_s1 + $0x260] sm:$0xff] }
  0xc9   :  { %v1317_v56 = vmax.f32 %v1285_v51, 0.0  ;;  %v2727_v58 = vpop.permute.xlu1 %93 }
  0xca   :  { %v2729_v59 = vpop.permute.xlu0 %88  ;;  %896 = vperm.xlu1 %2244, %v1962_v52   ;;  %v1918_v52 = vld [vmem:[%s3435_s1 + $0x1e8] sm:$0xff] }
  0xcb   :  { %891 = vperm.xlu0 %2243, %v1961_v55   ;;  %v2162_v62 = vpack.c.bf16 %v1318_v57, %v1317_v56  ;;  %v1917_v55 = vld [vmem:[%s3435_s1 + $0x1e0] sm:$0xff] }
  0xcd   :  { %2163 = vmatprep.subr.bf16.mxu0 %v2162_v62  ;;  %v2743_v18 = vpop.permute.xlu1 %354  ;;  %v1980_v62 = vld [vmem:[%s3435_s1 + $0x3d8] sm:$0xff] }
  0xce   :  { %v2745_v21 = vpop.permute.xlu0 %349  ;;  %1146 = vperm.xlu1 %2244, %v1084_v63   ;;  %v1979_v63 = vld [vmem:[%s3435_s1 + $0x3d0] sm:$0xff] }
  0xcf   :  { %1141 = vperm.xlu0 %2243, %v1083_v0  }
  0xd1   :  { %v2763_v3 = vpop.permute.xlu1 %866 }
  0xd2   :  { %v2765_v24 = vpop.permute.xlu0 %861  ;;  %725 = vperm.xlu1 %2244, %v1948_v16   ;;  %v1016_v40 = vmul.f32 %v2677_v13, %v2763_v3 }
  0xd3   :  { %720 = vperm.xlu0 %2243, %v1947_v11   ;;  %v1015_v60 = vmul.f32 %v2677_v13, %v2765_v24 }
  0xd5   :  { %v1117_v38 = vpop.permute.xlu1 %1116 }
  0xd6   :  { %v1112_v49 = vpop.permute.xlu0 %1111  ;;  %v1270_v41 = vadd.f32 %v1117_v38, %v1046_v48  ;;  %645 = vperm.xlu1 %2244, %v1932_v8   ;;  %v802_v8 = vadd.f32 %v770_v12, %v541_v23  ;;  %v1901_v48 = vld [vmem:[%s3435_s1 + $0x160] sm:$0xff]  ;;  %v1934_v23 = vld [vmem:[%s3435_s1 + $0x268] sm:$0xff] }
  0xd7   :  { %v1269_v42 = vadd.f32 %v1112_v49, %v1045_v19  ;;  %640 = vperm.xlu0 %2243, %v1931_v34   ;;  %v1902_v34 = vld [vmem:[%s3435_s1 + $0x168] sm:$0xff] }
  0xd8   :  { %v1302_v46 = vmax.f32 %v1270_v41, 0.0  ;;  %v1063_v19 = vadd.f32 %v1031_v53, %v802_v8 }
  0xd9   :  { %v1301_v47 = vmax.f32 %v1269_v42, 0.0  ;;  %v2779_v36 = vpop.permute.xlu1 %695  ;;  %v1964_v42 = vld [vmem:[%s3435_s1 + $0x358] sm:$0xff] }
  0xda   :  { %v2781_v50 = vpop.permute.xlu0 %690  ;;  %213 = vperm.xlu1 %2244, %v63_v45   ;;  %v1963_v45 = vld [vmem:[%s3435_s1 + $0x350] sm:$0xff] }
  0xdb   :  { %208 = vperm.xlu0 %2243, %v62_v35   ;;  %v2164_v51 = vpack.c.bf16 %v1302_v46, %v1301_v47 }
  0xdd   :  { %2165 = vmatpush3.bf16.msra.mxu0 %v2164_v51  ;;  %v2789_v56 = vpop.permute.xlu1 %615 }
  0xde   :  { %v2791_v57 = vpop.permute.xlu0 %610  ;;  %474 = vperm.xlu1 %2244, %v1918_v52  }
  0xdf   :  { %469 = vperm.xlu0 %2243, %v1917_v55   ;;  %v1086_v55 = vld [vmem:[%s3436_s2 + $0x48] sm:$0xff] }
  0xe1   :  { %v2799_v0 = vpop.permute.xlu1 %183 }
  0xe2   :  { %v2801_v1 = vpop.permute.xlu0 %178  ;;  %986 = vperm.xlu1 %2244, %v1980_v62   ;;  %v1085_v62 = vld [vmem:[%s3436_s2 + $0x40] sm:$0xff] }
  0xe3   :  { %981 = vperm.xlu0 %2243, %v1979_v63   ;;  %v494_v63 = vmul.f32 %v2667_v2, %v2624_v43  ;;  %v754_v43 = vmul.f32 %v2675_v10, %v2659_v61 }
  0xe5   :  { %v2815_v16 = vpop.permute.xlu1 %444 }
  0xe6   :  { %v2817_v11 = vpop.permute.xlu0 %439  ;;  %1236 = vperm.xlu1 %2244, %v1102_v14   ;;  %v493_v14 = vmul.f32 %v2667_v2, %v2626_v44  ;;  %v1950_v44 = vld [vmem:[%s3435_s1 + $0x2e8] sm:$0xff] }
  0xe7   :  { %1231 = vperm.xlu0 %2243, %v1101_v17   ;;  %v233_v17 = vmul.f32 %v2669_v5, %v2614_v39  ;;  %v1949_v39 = vld [vmem:[%s3435_s1 + $0x2e0] sm:$0xff] }
  0xe8   :  { %v525_v12 = vadd.f32 %v493_v14, %v232_v15  ;;  %v1104_v14 = vld [vmem:[%s3436_s2 + $0xd8] sm:$0xff]  ;;  %v512_v15 = vmul.f32 %v2667_v2, %v2693_v26 }
  0xe9   :  { %v2835_v4 = vpop.permute.xlu1 %956  ;;  %v526_v33 = vadd.f32 %v494_v63, %v233_v17  ;;  %v1103_v17 = vld [vmem:[%s3436_s2 + $0xd0] sm:$0xff]  ;;  %v49_v26 = vld [vmem:[%s3435_s1 + $0x78] sm:$0xff] }
  0xea   :  { %v2837_v54 = vpop.permute.xlu0 %951  ;;  %133 = vperm.xlu1 %2244, %v47_v31   ;;  %v786_v32 = vadd.f32 %v754_v43, %v525_v12  ;;  %v251_v43 = vmul.f32 %v2669_v5, %v2671_v6  ;;  %v773_v12 = vmul.f32 %v2675_v10, %v2779_v36  ;;  %v48_v6 = vld [vmem:[%s3435_s1 + $0x70] sm:$0xff] }
  0xeb   :  { %128 = vperm.xlu0 %2243, %v46_v27   ;;  %v787_v27 = vadd.f32 %v755_v30, %v526_v33  ;;  %v511_v30 = vmul.f32 %v2667_v2, %v2695_v29  ;;  %v250_v33 = vmul.f32 %v2669_v5, %v2673_v9  ;;  %v1034_v9 = vmul.f32 %v2677_v13, %v2835_v4 }
  0xec   :  { %v1047_v53 = vadd.f32 %v1015_v60, %v786_v32  ;;  %v544_v29 = vadd.f32 %v512_v15, %v251_v43  ;;  %v1033_v36 = vmul.f32 %v2677_v13, %v2837_v54  ;;  %v234_v43 = vmul.f32 %v2669_v5, %v2729_v59 }
  0xed   :  { %v1207_v38 = vpop.permute.xlu1 %1206  ;;  %v1048_v3 = vadd.f32 %v1016_v40, %v787_v27  ;;  %v772_v40 = vmul.f32 %v2675_v10, %v2781_v50  ;;  %v543_v60 = vadd.f32 %v511_v30, %v250_v33  ;;  %v757_v33 = vmul.f32 %v2675_v10, %v2789_v56 }
  0xee   :  { %v1202_v20 = vpop.permute.xlu0 %1201  ;;  %v1288_v49 = vadd.f32 %v1207_v38, %v1064_v37  ;;  %394 = vperm.xlu1 %2244, %v1902_v34   ;;  %v64_v37 = vld [vmem:[%s3435_s1 + $0xf0] sm:$0xff]  ;;  %v805_v32 = vadd.f32 %v773_v12, %v544_v29 }
  0xef   :  { %v1287_v41 = vadd.f32 %v1202_v20, %v1063_v19  ;;  %389 = vperm.xlu0 %2243, %v1901_v48   ;;  %v65_v48 = vld [vmem:[%s3435_s1 + $0xf8] sm:$0xff] }
  0xf0   :  { %v1320_v35 = vmax.f32 %v1288_v49, 0.0  ;;  %v1066_v4 = vadd.f32 %v1034_v9, %v805_v32  ;;  %v1935_v9 = vld [vmem:[%s3435_s1 + $0x270] sm:$0xff] }
  0xf1   :  { %v1319_v46 = vmax.f32 %v1287_v41, 0.0  ;;  %v2851_v47 = vpop.permute.xlu1 %103 }
  0xf2   :  { %v2853_v51 = vpop.permute.xlu0 %98  ;;  %906 = vperm.xlu1 %2244, %v1964_v42   ;;  %v1920_v42 = vld [vmem:[%s3435_s1 + $0x1f8] sm:$0xff] }
  0xf3   :  { %901 = vperm.xlu0 %2243, %v1963_v45   ;;  %v2166_v52 = vpack.c.bf16 %v1320_v35, %v1319_v46  ;;  %v1919_v45 = vld [vmem:[%s3435_s1 + $0x1f0] sm:$0xff] }
  0xf5   :  { %2167 = vmatprep.subr.bf16.mxu0 %v2166_v52  ;;  %v2867_v22 = vpop.permute.xlu1 %364  ;;  %v1982_v52 = vld [vmem:[%s3435_s1 + $0x3e8] sm:$0xff] }
  0xf6   :  { %v2869_v25 = vpop.permute.xlu0 %359  ;;  %1156 = vperm.xlu1 %2244, %v1086_v55   ;;  %v1981_v55 = vld [vmem:[%s3435_s1 + $0x3e0] sm:$0xff] }
  0xf7   :  { %1151 = vperm.xlu0 %2243, %v1085_v62  }
  0xf9   :  { %v2887_v31 = vpop.permute.xlu1 %876 }
  0xfa   :  { %v2889_v61 = vpop.permute.xlu0 %871  ;;  %735 = vperm.xlu1 %2244, %v1950_v44   ;;  %v1018_v59 = vmul.f32 %v2677_v13, %v2887_v31 }
  0xfb   :  { %730 = vperm.xlu0 %2243, %v1949_v39   ;;  %v1017_v56 = vmul.f32 %v2677_v13, %v2889_v61 }
  0xfd   :  { %v1127_v7 = vpop.permute.xlu1 %1126 }
  0xfe   :  { %v1122_v24 = vpop.permute.xlu0 %1121  ;;  %v1272_v8 = vadd.f32 %v1127_v7, %v1048_v3  ;;  %655 = vperm.xlu1 %2244, %v1934_v23   ;;  %v804_v23 = vadd.f32 %v772_v40, %v543_v60  ;;  %v1903_v3 = vld [vmem:[%s3435_s1 + $0x170] sm:$0xff]  ;;  %v1936_v60 = vld [vmem:[%s3435_s1 + $0x278] sm:$0xff] }
  0xff   :  { %v1271_v34 = vadd.f32 %v1122_v24, %v1047_v53  ;;  %650 = vperm.xlu0 %2243, %v1933_v28   ;;  %v1904_v28 = vld [vmem:[%s3435_s1 + $0x178] sm:$0xff] }
 0x100   :  { %v1304_v19 = vmax.f32 %v1272_v8, 0.0  ;;  %v1065_v53 = vadd.f32 %v1033_v36, %v804_v23 }
 0x101   :  { %v1303_v38 = vmax.f32 %v1271_v34, 0.0  ;;  %v2903_v20 = vpop.permute.xlu1 %705  ;;  %v1966_v34 = vld [vmem:[%s3435_s1 + $0x368] sm:$0xff] }
 0x102   :  { %v2905_v49 = vpop.permute.xlu0 %700  ;;  %223 = vperm.xlu1 %2244, %v65_v48   ;;  %v1965_v48 = vld [vmem:[%s3435_s1 + $0x360] sm:$0xff] }
 0x103   :  { %218 = vperm.xlu0 %2243, %v64_v37   ;;  %v2168_v41 = vpack.c.bf16 %v1304_v19, %v1303_v38 }
 0x105   :  { %2169 = vmatpush3.bf16.msra.mxu0 %v2168_v41  ;;  %v2913_v35 = vpop.permute.xlu1 %625 }
 0x106   :  { %v2915_v46 = vpop.permute.xlu0 %620  ;;  %484 = vperm.xlu1 %2244, %v1920_v42  }
 0x107   :  { %479 = vperm.xlu0 %2243, %v1919_v45   ;;  %v1088_v45 = vld [vmem:[%s3436_s2 + $0x58] sm:$0xff] }
 0x109   :  { %v2923_v62 = vpop.permute.xlu1 %193 }
 0x10a   :  { %v2925_v63 = vpop.permute.xlu0 %188  ;;  %996 = vperm.xlu1 %2244, %v1982_v52   ;;  %v1087_v52 = vld [vmem:[%s3436_s2 + $0x50] sm:$0xff] }
 0x10b   :  { %991 = vperm.xlu0 %2243, %v1981_v55   ;;  %v496_v55 = vmul.f32 %v2667_v2, %v2743_v18  ;;  %v756_v18 = vmul.f32 %v2675_v10, %v2791_v57 }
 0x10d   :  { %v2939_v44 = vpop.permute.xlu1 %454 }
 0x10e   :  { %v2941_v39 = vpop.permute.xlu0 %449  ;;  %1246 = vperm.xlu1 %2244, %v1104_v14   ;;  %v495_v14 = vmul.f32 %v2667_v2, %v2745_v21  ;;  %v1952_v21 = vld [vmem:[%s3435_s1 + $0x2f8] sm:$0xff] }
 0x10f   :  { %1241 = vperm.xlu0 %2243, %v1103_v17   ;;  %v235_v17 = vmul.f32 %v2669_v5, %v2727_v58  ;;  %v1951_v58 = vld [vmem:[%s3435_s1 + $0x2f0] sm:$0xff] }
 0x110   :  { %v527_v40 = vadd.f32 %v495_v14, %v234_v43  ;;  %v514_v14 = vmul.f32 %v2667_v2, %v2815_v16  ;;  %v1090_v43 = vld [vmem:[%s3436_s2 + $0x68] sm:$0xff]  ;;  %v775_v16 = vmul.f32 %v2675_v10, %v2903_v20  ;;  %v1108_v20 = vld [vmem:[%s3436_s2 + $0xf8] sm:$0xff] }
 0x111   :  { %v2959_v27 = vpop.permute.xlu1 %966  ;;  %v528_v12 = vadd.f32 %v496_v55, %v235_v17  ;;  %v513_v17 = vmul.f32 %v2667_v2, %v2817_v11  ;;  %v774_v11 = vmul.f32 %v2675_v10, %v2905_v49  ;;  %v1107_v49 = vld [vmem:[%s3436_s2 + $0xf0] sm:$0xff] }
 0x112   :  { %v2961_v50 = vpop.permute.xlu0 %961  ;;  %143 = vperm.xlu1 %2244, %v49_v26   ;;  %v788_v29 = vadd.f32 %v756_v18, %v527_v40  ;;  %v253_v18 = vmul.f32 %v2669_v5, %v2799_v0 }
 0x113   :  { %138 = vperm.xlu0 %2243, %v48_v6   ;;  %v789_v6 = vadd.f32 %v757_v33, %v528_v12  ;;  %v1089_v33 = vld [vmem:[%s3436_s2 + $0x60] sm:$0xff] }
 0x114   :  { %v1049_v36 = vadd.f32 %v1017_v56, %v788_v29  ;;  %v546_v0 = vadd.f32 %v514_v14, %v253_v18  ;;  %v1036_v29 = vmul.f32 %v2677_v13, %v2959_v27  ;;  %v1091_v27 = vld [vmem:[%s3436_s2 + $0x70] sm:$0xff] }
 0x115   :  { %v1217_v7 = vpop.permute.xlu1 %1216  ;;  %v1050_v31 = vadd.f32 %v1018_v59, %v789_v6  ;;  %v1367_v18 = vld [vmem:[%s3438_s4 + $0x10] sm:$0xff] }
 0x116   :  { %v1212_v54 = vpop.permute.xlu0 %1211  ;;  %v1290_v24 = vadd.f32 %v1217_v7, %v1066_v4  ;;  %404 = vperm.xlu1 %2244, %v1904_v28   ;;  %v1983_v4 = vld [vmem:[%s3435_s1 + $0x3f0] sm:$0xff] }
 0x117   :  { %v1289_v8 = vadd.f32 %v1212_v54, %v1065_v53  ;;  %399 = vperm.xlu0 %2243, %v1903_v3   ;;  %v1984_v3 = vld [vmem:[%s3435_s1 + $0x3f8] sm:$0xff] }
 0x118   :  { %v1322_v37 = vmax.f32 %v1290_v24, 0.0 }
 0x119   :  { %v1321_v19 = vmax.f32 %v1289_v8, 0.0  ;;  %v2975_v38 = vpop.permute.xlu1 %113 }
 0x11a   :  { %v2977_v41 = vpop.permute.xlu0 %108  ;;  %916 = vperm.xlu1 %2244, %v1966_v34   ;;  %v1106_v34 = vld [vmem:[%s3436_s2 + $0xe8] sm:$0xff] }
 0x11b   :  { %911 = vperm.xlu0 %2243, %v1965_v48   ;;  %v2170_v42 = vpack.c.bf16 %v1322_v37, %v1321_v19  ;;  %v1105_v48 = vld [vmem:[%s3436_s2 + $0xe0] sm:$0xff] }
 0x11d   :  { %2171 = vmatprep.subr.bf16.mxu0 %v2170_v42  ;;  %v2991_v15 = vpop.permute.xlu1 %374  ;;  %v1968_v42 = vld [vmem:[%s3435_s1 + $0x378] sm:$0xff] }
 0x11e   :  { %v2993_v30 = vpop.permute.xlu0 %369  ;;  %1166 = vperm.xlu1 %2244, %v1088_v45   ;;  %v1967_v45 = vld [vmem:[%s3435_s1 + $0x370] sm:$0xff] }
 0x11f   :  { %1161 = vperm.xlu0 %2243, %v1087_v52  }
 0x121   :  { %v3011_v26 = vpop.permute.xlu1 %886 }
 0x122   :  { %v3013_v57 = vpop.permute.xlu0 %881  ;;  %745 = vperm.xlu1 %2244, %v1952_v21   ;;  %v252_v21 = vmul.f32 %v2669_v5, %v2801_v1 }
 0x123   :  { %740 = vperm.xlu0 %2243, %v1951_v58  }
 0x124   :  { %v545_v1 = vadd.f32 %v513_v17, %v252_v21  ;;  %v498_v17 = vmul.f32 %v2667_v2, %v2867_v22  ;;  %v237_v21 = vmul.f32 %v2669_v5, %v2851_v47  ;;  %v759_v22 = vmul.f32 %v2675_v10, %v2913_v35 }
 0x125   :  { %v1137_v32 = vpop.permute.xlu1 %1136 }
 0x126   :  { %v1132_v61 = vpop.permute.xlu0 %1131  ;;  %v1274_v23 = vadd.f32 %v1137_v32, %v1050_v31  ;;  %665 = vperm.xlu1 %2244, %v1936_v60   ;;  %v1035_v60 = vmul.f32 %v2677_v13, %v2961_v50  ;;  %v530_v35 = vadd.f32 %v498_v17, %v237_v21  ;;  %v1378_v21 = vld [vmem:[%s3438_s4 + $0x68] sm:$0xff] }
 0x127   :  { %v1273_v28 = vadd.f32 %v1132_v61, %v1049_v36  ;;  %660 = vperm.xlu0 %2243, %v1935_v9   ;;  %v807_v61 = vadd.f32 %v775_v16, %v546_v0  ;;  %v236_v16 = vmul.f32 %v2669_v5, %v2853_v51  ;;  %v1020_v0 = vmul.f32 %v2677_v13, %v3011_v26  ;;  %v1371_v26 = vld [vmem:[%s3438_s4 + $0x30] sm:$0xff] }
 0x128   :  { %v1306_v53 = vmax.f32 %v1274_v23, 0.0  ;;  %v806_v23 = vadd.f32 %v774_v11, %v545_v1  ;;  %v1019_v1 = vmul.f32 %v2677_v13, %v3013_v57 }
 0x129   :  { %v1305_v7 = vmax.f32 %v1273_v28, 0.0  ;;  %v3027_v54 = vpop.permute.xlu1 %715  ;;  %v1092_v28 = vld [vmem:[%s3436_s2 + $0x78] sm:$0xff]  ;;  %v1068_v50 = vadd.f32 %v1036_v29, %v807_v61  ;;  %v791_v61 = vadd.f32 %v759_v22, %v530_v35  ;;  %v254_v35 = vmul.f32 %v2669_v5, %v2925_v63 }
 0x12a   :  { %v3029_v24 = vpop.permute.xlu0 %710  ;;  %1006 = vperm.xlu1 %2244, %v1984_v3   ;;  %v1067_v3 = vadd.f32 %v1035_v60, %v806_v23 }
 0x12b   :  { %1001 = vperm.xlu0 %2243, %v1983_v4   ;;  %v2172_v8 = vpack.c.bf16 %v1306_v53, %v1305_v7 }
 0x12d   :  { %2173 = vmatpush3.bf16.msra.mxu0 %v2172_v8  ;;  %v3037_v37 = vpop.permute.xlu1 %635 }
 0x12e   :  { %v3039_v19 = vpop.permute.xlu0 %630  ;;  %1256 = vperm.xlu1 %2244, %v1106_v34   ;;  %v1366_v34 = vld [vmem:[%s3438_s4 + $0x8] sm:$0xff] }
 0x12f   :  { %1251 = vperm.xlu0 %2243, %v1105_v48   ;;  %v1365_v48 = vld [vmem:[%s3438_s4] sm:$0xff] }
 0x131   :  { %v204_v52 = vpop.permute.xlu1 %203 }
 0x132   :  { %v199_v55 = vpop.permute.xlu0 %198  ;;  %926 = vperm.xlu1 %2244, %v1968_v42   ;;  %v257_v58 = vmul.f32 %v2669_v5, %v204_v52 }
 0x133   :  { %921 = vperm.xlu0 %2243, %v1967_v45   ;;  %v256_v59 = vmul.f32 %v2669_v5, %v199_v55 }
 0x135   :  { %v465_v12 = vpop.permute.xlu1 %464 }
 0x136   :  { %v460_v40 = vpop.permute.xlu0 %459  ;;  %v518_v56 = vmul.f32 %v2667_v2, %v465_v12  ;;  %1176 = vperm.xlu1 %2244, %v1090_v43   ;;  %v497_v43 = vmul.f32 %v2667_v2, %v2869_v25  ;;  %v758_v25 = vmul.f32 %v2675_v10, %v2915_v46  ;;  %v1370_v46 = vld [vmem:[%s3438_s4 + $0x28] sm:$0xff] }
 0x137   :  { %v517_v6 = vmul.f32 %v2667_v2, %v460_v40  ;;  %1171 = vperm.xlu0 %2243, %v1089_v33   ;;  %v1368_v33 = vld [vmem:[%s3438_s4 + $0x18] sm:$0xff]  ;;  %v1334_v40 = vld [vmem:[%s3437_s3 + $0x8] sm:$0xff] }
 0x138   :  { %v3079_v9 = vadd.f32 %v518_v56, %v257_v58  ;;  %v529_v56 = vadd.f32 %v497_v43, %v236_v16  ;;  %1525 = vmatprep.mubr.f32.mxu0 %v1334_v40  ;;  %v1377_v16 = vld [vmem:[%s3438_s4 + $0x60] sm:$0xff]  ;;  %v515_v40 = vmul.f32 %v2667_v2, %v2941_v39  ;;  %v776_v39 = vmul.f32 %v2675_v10, %v3029_v24 }
 0x139   :  { %v3081_v31 = vadd.f32 %v517_v6, %v256_v59  ;;  %v3083_v36 = vpop.permute.xlu1 %976  ;;  %v1369_v6 = vld [vmem:[%s3438_s4 + $0x20] sm:$0xff] }
 0x13a   :  { %v3085_v32 = vpop.permute.xlu0 %971  ;;  %1266 = vperm.xlu1 %2244, %v1108_v20   ;;  %v790_v23 = vadd.f32 %v758_v25, %v529_v56  ;;  %v547_v63 = vadd.f32 %v515_v40, %v254_v35  ;;  %v1630_v24 = vld [vmem:[%s3440_s6] sm:$0xff] }
 0x13b   :  { %1261 = vperm.xlu0 %2243, %v1107_v49  }
 0x13c   :  { %v1051_v57 = vadd.f32 %v1019_v1, %v790_v23 }
 0x13d   :  { %v1227_v4 = vpop.permute.xlu1 %1226 }
 0x13e   :  { %v1222_v53 = vpop.permute.xlu0 %1221  ;;  %v1292_v7 = vadd.f32 %v1227_v4, %v1068_v50  ;;  %1186 = vperm.xlu1 %2244, %v1092_v28   ;;  %v1372_v28 = vld [vmem:[%s3438_s4 + $0x38] sm:$0xff] }
 0x13f   :  { %v1291_v8 = vadd.f32 %v1222_v53, %v1067_v3  ;;  %1181 = vperm.xlu0 %2243, %v1091_v27   ;;  %v1052_v27 = vadd.f32 %v1020_v0, %v791_v61  ;;  %v1037_v61 = vmul.f32 %v2677_v13, %v3085_v32 }
 0x140   :  { %v1324_v42 = vmax.f32 %v1292_v7, 0.0  ;;  %v1374_v7 = vld [vmem:[%s3438_s4 + $0x48] sm:$0xff] }
 0x141   :  { %v1323_v45 = vmax.f32 %v1291_v8, 0.0  ;;  %v124_v52 = vpop.permute.xlu1 %123  ;;  %v1373_v8 = vld [vmem:[%s3438_s4 + $0x40] sm:$0xff] }
 0x142   :  { %v119_v55 = vpop.permute.xlu0 %118  ;;  %1388 = vperm.xlu1 %2244, %v1366_v34   ;;  %v241_v11 = vmul.f32 %v2669_v5, %v124_v52 }
 0x143   :  { %v2174_v14 = vpack.c.bf16 %v1324_v42, %v1323_v45  ;;  %1383 = vperm.xlu0 %2243, %v1365_v48   ;;  %v240_v47 = vmul.f32 %v2669_v5, %v119_v55  ;;  %v1376_v55 = vld [vmem:[%s3438_s4 + $0x58] sm:$0xff] }
 0x145   :  { %2175 = vmatprep.subr.bf16.mxu0 %v2174_v14  ;;  %v385_v58 = vpop.permute.xlu1 %384  ;;  %v1375_v14 = vld [vmem:[%s3438_s4 + $0x50] sm:$0xff] }
 0x146   :  { %v380_v12 = vpop.permute.xlu0 %379  ;;  %v502_v59 = vmul.f32 %v2667_v2, %v385_v58  ;;  %1398 = vperm.xlu1 %2244, %v1368_v33  }
 0x147   :  { %v501_v51 = vmul.f32 %v2667_v2, %v380_v12  ;;  %1393 = vperm.xlu0 %2243, %v1367_v18   ;;  %v516_v12 = vmul.f32 %v2667_v2, %v2939_v44  ;;  %v777_v44 = vmul.f32 %v2675_v10, %v3027_v54  ;;  %v1631_v54 = vld [vmem:[%s3440_s6 + $0x8] sm:$0xff] }
 0x148   :  { %v534_v20 = vadd.f32 %v502_v59, %v241_v11  ;;  %v1379_v59 = vld [vmem:[%s3438_s4 + $0x70] sm:$0xff] }
 0x149   :  { %v533_v49 = vadd.f32 %v501_v51, %v240_v47  ;;  %v3134_v29 = vpop.permute.xlu1 %896  ;;  %v1380_v47 = vld [vmem:[%s3438_s4 + $0x78] sm:$0xff]  ;;  %v255_v51 = vmul.f32 %v2669_v5, %v2923_v62 }
 0x14a   :  { %v3136_v60 = vpop.permute.xlu0 %891  ;;  %1408 = vperm.xlu1 %2244, %v1370_v46  }
 0x14b   :  { %1403 = vperm.xlu0 %2243, %v1369_v6   ;;  %v548_v62 = vadd.f32 %v516_v12, %v255_v51  ;;  %v238_v12 = vmul.f32 %v2669_v5, %v2977_v41 }
 0x14d   :  { %v1147_v50 = vpop.permute.xlu1 %1146 }
 0x14e   :  { %v1142_v3 = vpop.permute.xlu0 %1141  ;;  %v1276_v4 = vadd.f32 %v1147_v50, %v1052_v27  ;;  %1418 = vperm.xlu1 %2244, %v1372_v28   ;;  %v808_v50 = vadd.f32 %v776_v39, %v547_v63  ;;  %v1021_v39 = vmul.f32 %v2677_v13, %v3136_v60 }
 0x14f   :  { %v1275_v53 = vadd.f32 %v1142_v3, %v1051_v57  ;;  %1413 = vperm.xlu0 %2243, %v1371_v26   ;;  %v809_v57 = vadd.f32 %v777_v44, %v548_v62  ;;  %v1633_v3 = vld [vmem:[%s3440_s6 + $0x18] sm:$0xff] }
 0x150   :  { %v1308_v34 = vmax.f32 %v1276_v4, 0.0  ;;  %v1069_v4 = vadd.f32 %v1037_v61, %v808_v50 }
 0x151   :  { %v1307_v48 = vmax.f32 %v1275_v53, 0.0  ;;  %v3150_v42 = vpop.permute.xlu1 %725 }
 0x152   :  { %v3152_v45 = vpop.permute.xlu0 %720  ;;  %1428 = vperm.xlu1 %2244, %v1374_v7  }
 0x153   :  { %v2176_v52 = vpack.c.bf16 %v1308_v34, %v1307_v48  ;;  %1423 = vperm.xlu0 %2243, %v1373_v8   ;;  %v1635_v48 = vld [vmem:[%s3440_s6 + $0x28] sm:$0xff] }
 0x155   :  { %2177 = vmatpush3.bf16.msra.mxu0 %v2176_v52  ;;  %v646_v17 = vpop.permute.xlu1 %645  ;;  %v1634_v52 = vld [vmem:[%s3440_s6 + $0x20] sm:$0xff] }
 0x156   :  { %v641_v43 = vpop.permute.xlu0 %640  ;;  %v763_v33 = vmul.f32 %v2675_v10, %v646_v17  ;;  %1438 = vperm.xlu1 %2244, %v1376_v55  }
 0x157   :  { %v762_v18 = vmul.f32 %v2675_v10, %v641_v43  ;;  %1433 = vperm.xlu0 %2243, %v1375_v14  }
 0x158   :  { %v3168_v22 = vadd.f32 %v763_v33, %v534_v20 }
 0x159   :  { %v3170_v25 = vadd.f32 %v762_v18, %v533_v49  ;;  %v214_v11 = vpop.permute.xlu1 %213  ;;  %v1038_v49 = vmul.f32 %v2677_v13, %v3083_v36  ;;  %v1632_v36 = vld [vmem:[%s3440_s6 + $0x10] sm:$0xff]  ;;  %v500_v18 = vmul.f32 %v2667_v2, %v2991_v15  ;;  %v761_v15 = vmul.f32 %v2675_v10, %v3037_v37  ;;  %v1792_v37 = vld [vmem:[%s3442_s8] sm:$0x3] }
 0x15a   :  { %v209_v58 = vpop.permute.xlu0 %208  ;;  %1448 = vperm.xlu1 %2244, %v1378_v21   ;;  %v259_v56 = vmul.f32 %v2669_v5, %v214_v11  ;;  %v499_v21 = vmul.f32 %v2667_v2, %v2993_v30  ;;  %v1636_v11 = vld [vmem:[%s3440_s6 + $0x30] sm:$0xff]  ;;  %v760_v30 = vmul.f32 %v2675_v10, %v3039_v19  ;;  %v1022_v19 = vmul.f32 %v2677_v13, %v3134_v29 }
 0x15b   :  { %1443 = vperm.xlu0 %2243, %v1377_v16   ;;  %v258_v0 = vmul.f32 %v2669_v5, %v209_v58  ;;  %v1070_v32 = vadd.f32 %v1038_v49, %v809_v57  ;;  %v1637_v16 = vld [vmem:[%s3440_s6 + $0x38] sm:$0xff]  ;;  %v239_v58 = vmul.f32 %v2669_v5, %v2975_v38  ;;  %s1881_s6 = sshll.u32 %s2275_s30, 4  ;;  %s1882_s6 = int_to_ptr.vmem [resolvable:$true] %s1881_s6 }
 0x15c   :  { %v531_v41 = vadd.f32 %v499_v21, %v238_v12  ;;  %s2247_s0 = scalar_lea.vmem %s1882_s6, 32  ;;  %p2252_p1 = scmp.lt.s32.totalorder %s1882_s6, %s1882_s6 }
 0x15d   :  { %v475_v46 = vpop.permute.xlu1 %474  ;;  %v532_v44 = vadd.f32 %v500_v18, %v239_v58  ;;  %p2248_p0 = scmp.ne.s32.totalorder %s1882_s6, %s2247_s0  ;;  %p2253_p2 = scmp.lt.s32.totalorder %s2247_s0, %s2247_s0 }
 0x15e   :  { %v470_v6 = vpop.permute.xlu0 %469  ;;  %v520_v1 = vmul.f32 %v2667_v2, %v475_v46  ;;  %1458 = vperm.xlu1 %2244, %v1380_v47  }
 0x15f   :  { %v519_v20 = vmul.f32 %v2667_v2, %v470_v6  ;;  %1453 = vperm.xlu0 %2243, %v1379_v59   ;;  %p2254_p3 = por %p2253_p2, %p2252_p1 }
 0x160   :  { %v3204_v23 = vadd.f32 %v520_v1, %v259_v56  ;;  %v793_v1 = vadd.f32 %v761_v15, %v532_v44 }
 0x161   :  { %v3206_v28 = vadd.f32 %v519_v20, %v258_v0  ;;  %v3208_v26 = vpop.permute.xlu1 %986  ;;  %v792_v20 = vadd.f32 %v760_v30, %v531_v41  ;;  %p2255_p4 = pnand %p2254_p3, %p2248_p0 }
 0x162   :  { %v3210_v27 = vpop.permute.xlu0 %981  ;;  %1645 = vperm.xlu1 %2244, %v1631_v54   ;;  %v1054_v62 = vadd.f32 %v1022_v19, %v793_v1 }
 0x163   :  { %1640 = vperm.xlu0 %2243, %v1630_v24   ;;  %v1053_v63 = vadd.f32 %v1021_v39, %v792_v20 }
 0x165   :  { %v1237_v53 = vpop.permute.xlu1 %1236 }
 0x166   :  { %v1232_v7 = vpop.permute.xlu0 %1231  ;;  %v1294_v8 = vadd.f32 %v1237_v53, %v1070_v32  ;;  %1655 = vperm.xlu1 %2244, %v1633_v3  }
 0x167   :  { %v1293_v34 = vadd.f32 %v1232_v7, %v1069_v4  ;;  %1650 = vperm.xlu0 %2243, %v1632_v36  }
 0x168   :  { %v1326_v55 = vmax.f32 %v1294_v8, 0.0 }
 0x169   :  { %v1325_v14 = vmax.f32 %v1293_v34, 0.0  ;;  %v134_v17 = vpop.permute.xlu1 %133  ;;  %v779_v34 = vmul.f32 %v2675_v10, %v3150_v42 }
 0x16a   :  { %v129_v43 = vpop.permute.xlu0 %128  ;;  %1665 = vperm.xlu1 %2244, %v1635_v48   ;;  %v243_v40 = vmul.f32 %v2669_v5, %v134_v17  ;;  %v778_v48 = vmul.f32 %v2675_v10, %v3152_v45 }
 0x16b   :  { %v2178_v33 = vpack.c.bf16 %v1326_v55, %v1325_v14  ;;  %1660 = vperm.xlu0 %2243, %v1634_v52   ;;  %v242_v51 = vmul.f32 %v2669_v5, %v129_v43  ;;  %v1040_v52 = vmul.f32 %v2677_v13, %v3208_v26  ;;  %v1039_v55 = vmul.f32 %v2677_v13, %v3210_v27 }
 0x16c   :  { %v811_v43 = vadd.f32 %v779_v34, %v3079_v9 }
 0x16d   :  { %2179 = vmatprep.subr.bf16.mxu0 %v2178_v33  ;;  %v395_v47 = vpop.permute.xlu1 %394  ;;  %v810_v33 = vadd.f32 %v778_v48, %v3081_v31 }
 0x16e   :  { %v390_v59 = vpop.permute.xlu0 %389  ;;  %v504_v35 = vmul.f32 %v2667_v2, %v395_v47  ;;  %1675 = vperm.xlu1 %2244, %v1637_v16   ;;  %v1072_v18 = vadd.f32 %v1040_v52, %v811_v43 }
 0x16f   :  { %v503_v38 = vmul.f32 %v2667_v2, %v390_v59  ;;  %1670 = vperm.xlu0 %2243, %v1636_v11   ;;  %v1071_v21 = vadd.f32 %v1039_v55, %v810_v33 }
 0x170   :  { %v3253_v56 = vadd.f32 %v504_v35, %v243_v40 }
 0x171   :  { %v3255_v46 = vadd.f32 %v503_v38, %v242_v51  ;;  %v907_v6 = vpop.permute.xlu1 %906 }
 0x172   :  { %v902_v0 = vpop.permute.xlu0 %901  ;;  %v1024_v47 = vmul.f32 %v2677_v13, %v907_v6 }
 0x173   :  { %1795 = vperm.xlu0 %2243, %v1792_v37   ;;  %v1023_v9 = vmul.f32 %v2677_v13, %v902_v0 }
 0x174   :  { %v1056_v51 = vadd.f32 %v1024_v47, %v3168_v22 }
 0x175   :  { %v1157_v54 = vpop.permute.xlu1 %1156  ;;  %v1055_v35 = vadd.f32 %v1023_v9, %v3170_v25 }
 0x176   :  { %v1152_v24 = vpop.permute.xlu0 %1151  ;;  %v1278_v49 = vadd.f32 %v1157_v54, %v1054_v62 }
 0x177   :  { %v1277_v61 = vadd.f32 %v1152_v24, %v1053_v63 }
 0x178   :  { %v1310_v57 = vmax.f32 %v1278_v49, 0.0 }
 0x179   :  { %v1309_v29 = vmax.f32 %v1277_v61, 0.0  ;;  %v736_v50 = vpop.permute.xlu1 %735 }
 0x17a   :  { %v731_v3 = vpop.permute.xlu0 %730  ;;  %v781_v0 = vmul.f32 %v2675_v10, %v736_v50 }
 0x17b   :  { %v2180_v60 = vpack.c.bf16 %v1310_v57, %v1309_v29  ;;  %v780_v54 = vmul.f32 %v2675_v10, %v731_v3 }
 0x17c   :  { %v813_v61 = vadd.f32 %v781_v0, %v3204_v23 }
 0x17d   :  { %2181 = vmatpush3.bf16.msra.mxu0 %v2180_v60  ;;  %v656_v36 = vpop.permute.xlu1 %655  ;;  %v812_v57 = vadd.f32 %v780_v54, %v3206_v28 }
 0x17e   :  { %v651_v32 = vpop.permute.xlu0 %650  ;;  %v765_v34 = vmul.f32 %v2675_v10, %v656_v36 }
 0x17f   :  { %v764_v48 = vmul.f32 %v2675_v10, %v651_v32 }
 0x180   :  { %v797_v32 = vadd.f32 %v765_v34, %v3253_v56 }
 0x181   :  { %v224_v4 = vpop.permute.xlu1 %223 }
 0x182   :  { %v219_v53 = vpop.permute.xlu0 %218  ;;  %v261_v43 = vmul.f32 %v2669_v5, %v224_v4 }
 0x183   :  { %v260_v23 = vmul.f32 %v2669_v5, %v219_v53 }
 0x185   :  { %v485_v7 = vpop.permute.xlu1 %484 }
 0x186   :  { %v480_v8 = vpop.permute.xlu0 %479  ;;  %v522_v3 = vmul.f32 %v2667_v2, %v485_v7 }
 0x187   :  { %v521_v55 = vmul.f32 %v2667_v2, %v480_v8 }
 0x189   :  { %v997_v14 = vpop.permute.xlu1 %996  ;;  %v553_v4 = vadd.f32 %v521_v55, %v260_v23  ;;  %v1338_v55 = vld [vmem:[%s3437_s3 + $0x28] sm:$0xff] }
 0x18a   :  { %v992_v17 = vpop.permute.xlu0 %991  ;;  %v1042_v22 = vmul.f32 %v2677_v13, %v997_v14  ;;  %v1342_v23 = vld [vmem:[%s3437_s3 + $0x48] sm:$0xff] }
 0x18b   :  { %v1041_v25 = vmul.f32 %v2677_v13, %v992_v17 }
 0x18c   :  { %v1074_v29 = vadd.f32 %v1042_v22, %v813_v61 }
 0x18d   :  { %v1247_v16 = vpop.permute.xlu1 %1246  ;;  %v1073_v60 = vadd.f32 %v1041_v25, %v812_v57 }
 0x18e   :  { %v1242_v11 = vpop.permute.xlu0 %1241  ;;  %v1296_v42 = vadd.f32 %v1247_v16, %v1072_v18 }
 0x18f   :  { %v1295_v58 = vadd.f32 %v1242_v11, %v1071_v21  ;;  %v796_v11 = vadd.f32 %v764_v48, %v3255_v46 }
 0x190   :  { %v1328_v12 = vmax.f32 %v1296_v42, 0.0  ;;  %v554_v42 = vadd.f32 %v522_v3, %v261_v43  ;;  %v1335_v3 = vld [vmem:[%s3437_s3 + $0x10] sm:$0xff] }
 0x191   :  { %v1327_v45 = vmax.f32 %v1295_v58, 0.0  ;;  %v144_v15 = vpop.permute.xlu1 %143  ;;  %v1339_v43 = vld [vmem:[%s3437_s3 + $0x30] sm:$0xff] }
 0x192   :  { %v3267_v30 = vpop.permute.xlu0 %138  ;;  %v245_v56 = vmul.f32 %v2669_v5, %v144_v15 }
 0x193   :  { %v2182_v26 = vpack.c.bf16 %v1328_v12, %v1327_v45 }
 0x195   :  { %2183 = vmatprep.subr.bf16.mxu0 %v2182_v26  ;;  %v405_v27 = vpop.permute.xlu1 %404 }
 0x196   :  { %v400_v40 = vpop.permute.xlu0 %399  ;;  %v506_v53 = vmul.f32 %v2667_v2, %v405_v27 }
 0x197   :  { %v505_v12 = vmul.f32 %v2667_v2, %v400_v40 }
 0x199   :  { %v917_v31 = vpop.permute.xlu1 %916 }
 0x19a   :  { %v912_v59 = vpop.permute.xlu0 %911  ;;  %v1026_v28 = vmul.f32 %v2677_v13, %v917_v31  ;;  %v244_v31 = vmul.f32 %v2669_v5, %v3267_v30 }
 0x19b   :  { %v1025_v33 = vmul.f32 %v2677_v13, %v912_v59 }
 0x19c   :  { %v1058_v47 = vadd.f32 %v1026_v28, %v797_v32  ;;  %v1341_v28 = vld [vmem:[%s3437_s3 + $0x40] sm:$0xff] }
 0x19d   :  { %v1167_v38 = vpop.permute.xlu1 %1166  ;;  %v1057_v9 = vadd.f32 %v1025_v33, %v796_v11  ;;  %v1344_v33 = vld [vmem:[%s3437_s3 + $0x58] sm:$0xff]  ;;  %v1345_v32 = vld [vmem:[%s3437_s3 + $0x60] sm:$0xff] }
 0x19e   :  { %v1162_v44 = vpop.permute.xlu0 %1161  ;;  %v1280_v41 = vadd.f32 %v1167_v38, %v1056_v51  ;;  %v1352_v11 = vld [vmem:[%s3437_s3 + $0x98] sm:$0xff] }
 0x19f   :  { %v1279_v37 = vadd.f32 %v1162_v44, %v1055_v35  ;;  %v538_v44 = vadd.f32 %v506_v53, %v245_v56  ;;  %v1356_v53 = vld [vmem:[%s3437_s3 + $0xb8] sm:$0xff] }
 0x1a0   :  { %v1312_v19 = vmax.f32 %v1280_v41, 0.0  ;;  %v537_v41 = vadd.f32 %v505_v12, %v244_v31  ;;  %v1355_v12 = vld [vmem:[%s3437_s3 + $0xb0] sm:$0xff]  ;;  %v1360_v56 = vld [vmem:[%s3437_s3 + $0xd8] sm:$0xff]  ;;  %v1361_v31 = vld [vmem:[%s3437_s3 + $0xe0] sm:$0xff] }
 0x1a1   :  { %v1311_v39 = vmax.f32 %v1279_v37, 0.0  ;;  %v746_v1 = vpop.permute.xlu1 %745 }
 0x1a2   :  { %v741_v20 = vpop.permute.xlu0 %740  ;;  %v783_v21 = vmul.f32 %v2675_v10, %v746_v1 }
 0x1a3   :  { %v2184_v62 = vpack.c.bf16 %v1312_v19, %v1311_v39  ;;  %v782_v7 = vmul.f32 %v2675_v10, %v741_v20 }
 0x1a4   :  { %v815_v46 = vadd.f32 %v783_v21, %v554_v42  ;;  %v1348_v21 = vld [vmem:[%s3437_s3 + $0x78] sm:$0xff]  ;;  %v1351_v42 = vld [vmem:[%s3437_s3 + $0x90] sm:$0xff] }
 0x1a5   :  { %2185 = vmatpush3.bf16.msra.mxu0 %v2184_v62  ;;  %v666_v63 = vpop.permute.xlu1 %665  ;;  %v814_v59 = vadd.f32 %v782_v7, %v553_v4  ;;  %v1347_v7 = vld [vmem:[%s3437_s3 + $0x70] sm:$0xff]  ;;  %v1354_v4 = vld [vmem:[%s3437_s3 + $0xa8] sm:$0xff] }
 0x1a6   :  { %v661_v6 = vpop.permute.xlu0 %660  ;;  %v767_v51 = vmul.f32 %v2675_v10, %v666_v63 }
 0x1a7   :  { %v766_v2 = vmul.f32 %v2675_v10, %v661_v6 }
 0x1a8   :  { %v799_v30 = vadd.f32 %v767_v51, %v538_v44  ;;  %v1622_v51 = vld [vmem:[%s3439_s5] sm:$0xff] }
 0x1a9   :  { %v1007_v24 = vpop.permute.xlu1 %1006  ;;  %v798_v63 = vadd.f32 %v766_v2, %v537_v41  ;;  %2131 = vmatprep.mubr.f32.mxu1 %v1622_v51 }
 0x1aa   :  { %v1002_v49 = vpop.permute.xlu0 %1001  ;;  %v1044_v45 = vmul.f32 %v2677_v13, %v1007_v24 }
 0x1ab   :  { %v1043_v26 = vmul.f32 %v2677_v13, %v1002_v49 }
 0x1ac   :  { %v1076_v37 = vadd.f32 %v1044_v45, %v815_v46  ;;  %v1358_v45 = vld [vmem:[%s3437_s3 + $0xc8] sm:$0xff]  ;;  %v1364_v46 = vld [vmem:[%s3437_s3 + $0xf8] sm:$0xff] }
 0x1ad   :  { %v1257_v52 = vpop.permute.xlu1 %1256  ;;  %v1075_v15 = vadd.f32 %v1043_v26, %v814_v59  ;;  %v1357_v26 = vld [vmem:[%s3437_s3 + $0xc0] sm:$0xff]  ;;  %v1363_v59 = vld [vmem:[%s3437_s3 + $0xf0] sm:$0xff] }
 0x1ae   :  { %v1252_v50 = vpop.permute.xlu0 %1251  ;;  %v1298_v14 = vadd.f32 %v1257_v52, %v1074_v29  ;;  %v1333_v52 = vld [vmem:[%s3437_s3] sm:$0xff] }
 0x1af   :  { %v1297_v17 = vadd.f32 %v1252_v50, %v1073_v60  ;;  %v1336_v50 = vld [vmem:[%s3437_s3 + $0x18] sm:$0xff] }
 0x1b0   :  { %v1330_v18 = vmax.f32 %v1298_v14, 0.0  ;;  %v1337_v14 = vld [vmem:[%s3437_s3 + $0x20] sm:$0xff] }
 0x1b1   :  { %v1329_v36 = vmax.f32 %v1297_v17, 0.0  ;;  %v927_v16 = vpop.permute.xlu1 %926  ;;  %v1340_v17 = vld [vmem:[%s3437_s3 + $0x38] sm:$0xff] }
 0x1b2   :  { %v922_v8 = vpop.permute.xlu0 %921  ;;  %v1028_v19 = vmul.f32 %v2677_v13, %v927_v16  ;;  %v1350_v16 = vld [vmem:[%s3437_s3 + $0x88] sm:$0xff] }
 0x1b3   :  { %v2186_v58 = vpack.c.bf16 %v1330_v18, %v1329_v36  ;;  %v1027_v39 = vmul.f32 %v2677_v13, %v922_v8  ;;  %v1343_v18 = vld [vmem:[%s3437_s3 + $0x50] sm:$0xff]  ;;  %v1346_v36 = vld [vmem:[%s3437_s3 + $0x68] sm:$0xff]  ;;  %v1349_v8 = vld [vmem:[%s3437_s3 + $0x80] sm:$0xff] }
 0x1b4   :  { %v1060_v25 = vadd.f32 %v1028_v19, %v799_v30 }
 0x1b5   :  { %2187 = vmatprep.subr.bf16.mxu0 %v2186_v58  ;;  %v1177_v35 = vpop.permute.xlu1 %1176  ;;  %v1059_v24 = vadd.f32 %v1027_v39, %v798_v63  ;;  %v1353_v58 = vld [vmem:[%s3437_s3 + $0xa0] sm:$0xff] }
 0x1b6   :  { %v1172_v27 = vpop.permute.xlu0 %1171  ;;  %v1282_v40 = vadd.f32 %v1177_v35, %v1058_v47  ;;  %v1359_v47 = vld [vmem:[%s3437_s3 + $0xd0] sm:$0xff] }
 0x1b7   :  { %v1281_v38 = vadd.f32 %v1172_v27, %v1057_v9  ;;  %v1362_v9 = vld [vmem:[%s3437_s3 + $0xe8] sm:$0xff] }
 0x1b8   :  { %v1314_v1 = vmax.f32 %v1282_v40, 0.0 }
 0x1b9   :  { %v1313_v5 = vmax.f32 %v1281_v38, 0.0  ;;  %v1267_v20 = vpop.permute.xlu1 %1266 }
 0x1ba   :  { %v1262_v62 = vpop.permute.xlu0 %1261  ;;  %v1300_v54 = vadd.f32 %v1267_v20, %v1076_v37 }
 0x1bb   :  { %v2188_v0 = vpack.c.bf16 %v1314_v1, %v1313_v5  ;;  %v1299_v22 = vadd.f32 %v1262_v62, %v1075_v15 }
 0x1bc   :  { %v1332_v10 = vmax.f32 %v1300_v54, 0.0 }
 0x1bd   :  { %v1331_v6 = vmax.f32 %v1299_v22, 0.0  ;;  %2189 = vmatpush3.bf16.msra.mxu0 %v2188_v0  ;;  %v1187_v49 = vpop.permute.xlu1 %1186 }
 0x1be   :  { %v1182_v61 = vpop.permute.xlu0 %1181  ;;  %v1284_v29 = vadd.f32 %v1187_v49, %v1060_v25 }
 0x1bf   :  { %v2190_v57 = vpack.c.bf16 %v1332_v10, %v1331_v6  ;;  %v1283_v60 = vadd.f32 %v1182_v61, %v1059_v24 }
 0x1c0   :  { %v1316_v13 = vmax.f32 %v1284_v29, 0.0 }
 0x1c1   :  { %v1315_v34 = vmax.f32 %v1283_v60, 0.0  ;;  %2191 = vmatprep.subr.bf16.mxu0 %v2190_v57  ;;  %v1389_v15 = vpop.permute.xlu1 %1388 }
 0x1c2   :  { %v1384_v38 = vpop.permute.xlu0 %1383 }
 0x1c3   :  { %v2192_v48 = vpack.c.bf16 %v1316_v13, %v1315_v34 }
 0x1c5   :  { %2193 = vmatpush3.bf16.msra.mxu0 %v2192_v48  ;;  %v1399_v6 = vpop.permute.xlu1 %1398 }
 0x1c6   :  { %v1394_v0 = vpop.permute.xlu0 %1393 }
 0x1c8   :  { %1526 = vmatmul.mubr.f32.vlgmr.msra.gmra.mrb[0].mxu0 %v1333_v52 }
 0x1c9   :  { %1530 = vmatprep.mubr.f32.mxu0 %v1336_v50 }
 0x1ca   :  { %v1404_v34 = vpop.permute.xlu0 %1403 }
 0x1cc   :  { %1531 = vmatmul.mubr.f32.gmra.mrb[2].mxu0 %v1335_v3  ;;  %v1409_v3 = vpop.permute.xlu1 %1408 }
 0x1cd   :  { %1535 = vmatprep.mubr.f32.mxu0 %v1338_v55 }
 0x1d0   :  { %1536 = vmatmul.mubr.f32.gmra.mrb[4].mxu0 %v1337_v14 }
 0x1d1   :  { %1540 = vmatprep.mubr.f32.mxu0 %v1340_v17 }
 0x1d4   :  { %1541 = vmatmul.mubr.f32.gmra.mrb[6].mxu0 %v1339_v43 }
 0x1d5   :  { %1545 = vmatprep.mubr.f32.mxu0 %v1342_v23 }
 0x1d8   :  { %1546 = vmatmul.mubr.f32.gmra.mrb[8].mxu0 %v1341_v28 }
 0x1d9   :  { %1550 = vmatprep.mubr.f32.mxu0 %v1344_v33 }
 0x1dc   :  { %1551 = vmatmul.mubr.f32.gmra.mrb[10].mxu0 %v1343_v18 }
 0x1dd   :  { %1555 = vmatprep.mubr.f32.mxu0 %v1346_v36  ;;  %v1414_v36 = vpop.permute.xlu0 %1413 }
 0x1e0   :  { %1556 = vmatmul.mubr.f32.gmra.mrb[12].mxu0 %v1345_v32 }
 0x1e1   :  { %1560 = vmatprep.mubr.f32.mxu0 %v1348_v21 }
 0x1e4   :  { %1561 = vmatmul.mubr.f32.gmra.mrb[14].mxu0 %v1347_v7 }
 0x1e5   :  { %1565 = vmatprep.mubr.f32.mxu0 %v1350_v16  ;;  %v1419_v16 = vpop.permute.xlu1 %1418 }
 0x1e8   :  { %1566 = vmatmul.mubr.f32.gmra.mrb[16].mxu0 %v1349_v8 }
 0x1e9   :  { %1570 = vmatprep.mubr.f32.mxu0 %v1352_v11 }
 0x1ec   :  { %1571 = vmatmul.mubr.f32.gmra.mrb[18].mxu0 %v1351_v42 }
 0x1ed   :  { %1575 = vmatprep.mubr.f32.mxu0 %v1354_v4 }
 0x1f0   :  { %1576 = vmatmul.mubr.f32.gmra.mrb[20].mxu0 %v1353_v58 }
 0x1f1   :  { %1580 = vmatprep.mubr.f32.mxu0 %v1356_v53 }
 0x1f4   :  { %1581 = vmatmul.mubr.f32.gmra.mrb[22].mxu0 %v1355_v12 }
 0x1f5   :  { %1585 = vmatprep.mubr.f32.mxu0 %v1358_v45 }
 0x1f8   :  { %1586 = vmatmul.mubr.f32.gmra.mrb[24].mxu0 %v1357_v26  ;;  %v1424_v26 = vpop.permute.xlu0 %1423 }
 0x1f9   :  { %1590 = vmatprep.mubr.f32.mxu0 %v1360_v56 }
 0x1fc   :  { %1591 = vmatmul.mubr.f32.gmra.mrb[26].mxu0 %v1359_v47 }
 0x1fd   :  { %1595 = vmatprep.mubr.f32.mxu0 %v1362_v9 }
 0x200   :  { %1596 = vmatmul.mubr.f32.gmra.mrb[28].mxu0 %v1361_v31  ;;  %v1429_v31 = vpop.permute.xlu1 %1428 }
 0x201   :  { %1600 = vmatprep.mubr.f32.mxu0 %v1364_v46 }
 0x204   :  { %1601 = vmatmul.mubr.f32.gmra.mrb[30].mxu0 %v1363_v59 }
 0x29b   :  { %v2018_v35 = vpop.f32.mrb[0].mxu0 }
 0x29c   :  { %v2019_v27 = vpop.f32.mrb[1].mxu0 }
 0x29d   :  { %v2020_v2 = vadd.f32 %v2019_v27, %v2018_v35 }
 0x29f   :  { %v2021_v40 = vpop.f32.mrb[2].mxu0  ;;  %v1528_v41 = vadd.f32 %v2020_v2, %v1384_v38 }
 0x2a0   :  { %v2022_v44 = vpop.f32.mrb[3].mxu0 }
 0x2a1   :  { %v2023_v37 = vadd.f32 %v2022_v44, %v2021_v40  ;;  %v1606_v5 = vmax.f32 %v1528_v41, 0.0  ;;  %v1434_v44 = vpop.permute.xlu0 %1433 }
 0x2a3   :  { %v1533_v19 = vadd.f32 %v2023_v37, %v1389_v15  ;;  %v2024_v39 = vpop.f32.mrb[4].mxu0 }
 0x2a4   :  { %v2025_v1 = vpop.f32.mrb[5].mxu0 }
 0x2a5   :  { %v1607_v30 = vmax.f32 %v1533_v19, 0.0  ;;  %v2026_v20 = vadd.f32 %v2025_v1, %v2024_v39  ;;  %v1439_v19 = vpop.permute.xlu1 %1438 }
 0x2a7   :  { %v2027_v62 = vpop.f32.mrb[6].mxu0  ;;  %v2194_v63 = vpack.c.bf16 %v1607_v30, %v1606_v5  ;;  %v1538_v22 = vadd.f32 %v2026_v20, %v1394_v0 }
 0x2a8   :  { %v2028_v54 = vpop.f32.mrb[7].mxu0 }
 0x2a9   :  { %v2029_v10 = vadd.f32 %v2028_v54, %v2027_v62  ;;  %2195 = vmatprep.subr.bf16.mxu1 %v2194_v63  ;;  %v1608_v61 = vmax.f32 %v1538_v22, 0.0  ;;  %v1444_v54 = vpop.permute.xlu0 %1443 }
 0x2aa   :  { %2197 = vmatpush3.bf16.msra.mxu1 %v2194_v63 }
 0x2ab   :  { %v1543_v25 = vadd.f32 %v2029_v10, %v1399_v6  ;;  %v2030_v24 = vpop.f32.mrb[8].mxu0 }
 0x2ac   :  { %v2031_v49 = vpop.f32.mrb[9].mxu0 }
 0x2ad   :  { %v1609_v57 = vmax.f32 %v1543_v25, 0.0  ;;  %v2032_v29 = vadd.f32 %v2031_v49, %v2030_v24  ;;  %v1449_v25 = vpop.permute.xlu1 %1448 }
 0x2af   :  { %v2033_v60 = vpop.f32.mrb[10].mxu0  ;;  %v2198_v13 = vpack.c.bf16 %v1609_v57, %v1608_v61  ;;  %v1548_v52 = vadd.f32 %v2032_v29, %v1404_v34 }
 0x2b0   :  { %v2034_v48 = vpop.f32.mrb[11].mxu0 }
 0x2b1   :  { %v2035_v50 = vadd.f32 %v2034_v48, %v2033_v60  ;;  %2199 = vmatprep.subr.bf16.mxu1 %v2198_v13  ;;  %v1610_v43 = vmax.f32 %v1548_v52, 0.0  ;;  %v1454_v48 = vpop.permute.xlu0 %1453 }
 0x2b2   :  { %2201 = vmatpush3.bf16.msra.mxu1 %v2198_v13 }
 0x2b3   :  { %v1553_v55 = vadd.f32 %v2035_v50, %v1409_v3  ;;  %v2036_v14 = vpop.f32.mrb[12].mxu0 }
 0x2b4   :  { %v2037_v17 = vpop.f32.mrb[13].mxu0 }
 0x2b5   :  { %v1611_v23 = vmax.f32 %v1553_v55, 0.0  ;;  %v2038_v28 = vadd.f32 %v2037_v17, %v2036_v14  ;;  %v1459_v55 = vpop.permute.xlu1 %1458 }
 0x2b7   :  { %v2039_v33 = vpop.f32.mrb[14].mxu0  ;;  %v2202_v18 = vpack.c.bf16 %v1611_v23, %v1610_v43  ;;  %v1558_v21 = vadd.f32 %v2038_v28, %v1414_v36  ;;  %v1623_v28 = vld [vmem:[%s3439_s5 + $0x8] sm:$0xff]  ;;  %v1626_v36 = vld [vmem:[%s3439_s5 + $0x20] sm:$0xff] }
 0x2b8   :  { %v2040_v32 = vpop.f32.mrb[15].mxu0 }
 0x2b9   :  { %v2041_v7 = vadd.f32 %v2040_v32, %v2039_v33  ;;  %2203 = vmatprep.subr.bf16.mxu1 %v2202_v18  ;;  %v1612_v4 = vmax.f32 %v1558_v21, 0.0  ;;  %v1624_v33 = vld [vmem:[%s3439_s5 + $0x10] sm:$0xff]  ;;  %v1627_v32 = vld [vmem:[%s3439_s5 + $0x28] sm:$0xff] }
 0x2ba   :  { %2205 = vmatpush3.bf16.msra.mxu1 %v2202_v18  ;;  %v1625_v18 = vld [vmem:[%s3439_s5 + $0x18] sm:$0xff]  ;;  %v1628_v21 = vld [vmem:[%s3439_s5 + $0x30] sm:$0xff] }
 0x2bb   :  { %v1563_v8 = vadd.f32 %v2041_v7, %v1419_v16  ;;  %v2042_v11 = vpop.f32.mrb[16].mxu0  ;;  %v1629_v7 = vld [vmem:[%s3439_s5 + $0x38] sm:$0xff]  ;;  %v2272_v16 = vmov 0.0|0.0  }
 0x2bc   :  { %v2043_v42 = vpop.f32.mrb[17].mxu0 }
 0x2bd   :  { %v1613_v58 = vmax.f32 %v1563_v8, 0.0  ;;  %v2044_v53 = vadd.f32 %v2043_v42, %v2042_v11  ;;  %v2274_v8 = vmov 0.0   ;;  %v1646_v11 = vpop.permute.xlu1 %1645  ;;  %v1641_v42 = vpop.permute.xlu0 %1640 }
 0x2bf   :  { %v2045_v12 = vpop.f32.mrb[18].mxu0  ;;  %v2206_v45 = vpack.c.bf16 %v1613_v58, %v1612_v4  ;;  %v1568_v47 = vadd.f32 %v2044_v53, %v1424_v26 }
 0x2c0   :  { %v2046_v56 = vpop.f32.mrb[19].mxu0 }
 0x2c1   :  { %v2047_v9 = vadd.f32 %v2046_v56, %v2045_v12  ;;  %2207 = vmatprep.subr.bf16.mxu1 %v2206_v45  ;;  %v1614_v35 = vmax.f32 %v1568_v47, 0.0  ;;  %v1656_v4 = vpop.permute.xlu1 %1655  ;;  %v1651_v53 = vpop.permute.xlu0 %1650 }
 0x2c2   :  { %2209 = vmatpush3.bf16.msra.mxu1 %v2206_v45 }
 0x2c3   :  { %v1573_v46 = vadd.f32 %v2047_v9, %v1429_v31  ;;  %v2048_v59 = vpop.f32.mrb[20].mxu0 }
 0x2c4   :  { %v2049_v51 = vpop.f32.mrb[21].mxu0 }
 0x2c5   :  { %v1615_v27 = vmax.f32 %v1573_v46, 0.0  ;;  %v2050_v2 = vadd.f32 %v2049_v51, %v2048_v59  ;;  %v1666_v59 = vpop.permute.xlu1 %1665 }
 0x2c7   :  { %v2051_v40 = vpop.f32.mrb[22].mxu0  ;;  %v2210_v38 = vpack.c.bf16 %v1615_v27, %v1614_v35  ;;  %v1578_v37 = vadd.f32 %v2050_v2, %v1434_v44  ;;  %v1661_v27 = vpop.permute.xlu0 %1660 }
 0x2c8   :  { %v2052_v41 = vpop.f32.mrb[23].mxu0 }
 0x2c9   :  { %v2053_v15 = vadd.f32 %v2052_v41, %v2051_v40  ;;  %2211 = vmatprep.subr.bf16.mxu1 %v2210_v38  ;;  %v1616_v30 = vmax.f32 %v1578_v37, 0.0 }
 0x2ca   :  { %2213 = vmatpush3.bf16.msra.mxu1 %v2210_v38 }
 0x2cb   :  { %v1583_v39 = vadd.f32 %v2053_v15, %v1439_v19  ;;  %v2054_v1 = vpop.f32.mrb[24].mxu0 }
 0x2cc   :  { %v2055_v5 = vpop.f32.mrb[25].mxu0 }
 0x2cd   :  { %v1617_v20 = vmax.f32 %v1583_v39, 0.0  ;;  %v2056_v62 = vadd.f32 %v2055_v5, %v2054_v1  ;;  %v1676_v39 = vpop.permute.xlu1 %1675 }
 0x2cf   :  { %v2057_v63 = vpop.f32.mrb[26].mxu0  ;;  %v2214_v0 = vpack.c.bf16 %v1617_v20, %v1616_v30  ;;  %v1588_v10 = vadd.f32 %v2056_v62, %v1444_v54  ;;  %v1671_v30 = vpop.permute.xlu0 %1670 }
 0x2d0   :  { %v2058_v22 = vpop.f32.mrb[27].mxu0 }
 0x2d1   :  { %v2059_v6 = vadd.f32 %v2058_v22, %v2057_v63  ;;  %2215 = vmatprep.subr.bf16.mxu1 %v2214_v0  ;;  %v1618_v57 = vmax.f32 %v1588_v10, 0.0 }
 0x2d2   :  { %2217 = vmatpush3.bf16.msra.mxu1 %v2214_v0 }
 0x2d3   :  { %v1593_v24 = vadd.f32 %v2059_v6, %v1449_v25  ;;  %v2060_v49 = vpop.f32.mrb[28].mxu0  ;;  %v1791_v6 = vld [vmem:[%s3441_s7] sm:$0x3]  ;;  %v1796_v25 = vpop.permute.xlu0 %1795 }
 0x2d4   :  { %v2061_v61 = vpop.f32.mrb[29].mxu0 }
 0x2d5   :  { %v1619_v29 = vmax.f32 %v1593_v24, 0.0  ;;  %v2062_v60 = vadd.f32 %v2061_v61, %v2060_v49 }
 0x2d7   :  { %v2063_v13 = vpop.f32.mrb[30].mxu0  ;;  %v2218_v34 = vpack.c.bf16 %v1619_v29, %v1618_v57  ;;  %v1598_v50 = vadd.f32 %v2062_v60, %v1454_v48 }
 0x2d8   :  { %v2064_v52 = vpop.f32.mrb[31].mxu0 }
 0x2d9   :  { %v2065_v3 = vadd.f32 %v2064_v52, %v2063_v13  ;;  %2219 = vmatprep.subr.bf16.mxu1 %v2218_v34  ;;  %v1620_v17 = vmax.f32 %v1598_v50, 0.0 }
 0x2da   :  { %2221 = vmatpush3.bf16.msra.mxu1 %v2218_v34 }
 0x2db   :  { %v1603_v14 = vadd.f32 %v2065_v3, %v1459_v55 }
 0x2dd   :  { %v1621_v43 = vmax.f32 %v1603_v14, 0.0 }
 0x2df   :  { %v2222_v23 = vpack.c.bf16 %v1621_v43, %v1620_v17 }
 0x2e1   :  { %2223 = vmatprep.subr.bf16.mxu1 %v2222_v23 }
 0x2e2   :  { %2225 = vmatpush3.bf16.msra.mxu1 %v2222_v23 }
 0x2e3   :  { %2226 = vmatprep.subr.bf16.mxu1 %v2272_v16 }
 0x2e5   :  { %2132 = vmatmul.mubr.f32.vlgmr.msra.gmra.mrb[0].mxu1 %v1623_v28 }
 0x2e6   :  { %2134 = vmatprep.mubr.f32.mxu1 %v1624_v33 }
 0x2e9   :  { %2135 = vmatmul.mubr.f32.gmra.mrb[2].mxu1 %v1625_v18 }
 0x2ea   :  { %2137 = vmatprep.mubr.f32.mxu1 %v1626_v36 }
 0x2ed   :  { %2138 = vmatmul.mubr.f32.gmra.mrb[4].mxu1 %v1627_v32 }
 0x2ee   :  { %2140 = vmatprep.mubr.f32.mxu1 %v1628_v21 }
 0x2f1   :  { %2141 = vmatmul.mubr.f32.gmra.mrb[6].mxu1 %v1629_v7 }
 0x2f2   :  { %2159 = vmatprep.mubr.msk.f32.mxu1 %vm2273_vm0, %v2274_v8 }
 0x3b8   :  { %v2133_v58 = vpop.f32.mrb[0].mxu1 }
 0x3b9   :  { %v1750_v12 = vadd.f32 %v2133_v58, %v1646_v11  ;;  %v1744_v45 = vpop.f32.mrb[1].mxu1 }
 0x3ba   :  { %v1745_v26 = vadd.f32 %v1744_v45, %v1641_v42 }
 0x3bb   :  { %v1784_v56 = vmax.f32 %v1750_v12, 0.0 }
 0x3bc   :  { %v1783_v47 = vmax.f32 %v1745_v26, 0.0  ;;  %v2136_v9 = vpop.f32.mrb[2].mxu1 }
 0x3bd   :  { %v1760_v31 = vadd.f32 %v2136_v9, %v1656_v4  ;;  %v1754_v46 = vpop.f32.mrb[3].mxu1 }
 0x3be   :  { %v2227_v51 = vpack.c.bf16 %v1784_v56, %v1783_v47  ;;  %v1755_v35 = vadd.f32 %v1754_v46, %v1651_v53 }
 0x3bf   :  { %v1786_v2 = vmax.f32 %v1760_v31, 0.0 }
 0x3c0   :  { %v1785_v40 = vmax.f32 %v1755_v35, 0.0  ;;  %v2139_v38 = vpop.f32.mrb[4].mxu1  ;;  %2228 = vmatpush3.bf16.msra.mxu1 %v2227_v51 }
 0x3c1   :  { %v1770_v44 = vadd.f32 %v2139_v38, %v1666_v59  ;;  %v1764_v41 = vpop.f32.mrb[5].mxu1  ;;  %2229 = vmatprep.subr.bf16.mxu1 %v2272_v16 }
 0x3c2   :  { %v2230_v37 = vpack.c.bf16 %v1786_v2, %v1785_v40  ;;  %v1765_v15 = vadd.f32 %v1764_v41, %v1661_v27 }
 0x3c3   :  { %v1788_v19 = vmax.f32 %v1770_v44, 0.0 }
 0x3c4   :  { %v1787_v1 = vmax.f32 %v1765_v15, 0.0  ;;  %v2142_v5 = vpop.f32.mrb[6].mxu1  ;;  %2231 = vmatpush3.bf16.msra.mxu1 %v2230_v37 }
 0x3c5   :  { %v1780_v20 = vadd.f32 %v2142_v5, %v1676_v39  ;;  %v1774_v62 = vpop.f32.mrb[7].mxu1  ;;  %2232 = vmatprep.subr.bf16.mxu1 %v2272_v16 }
 0x3c6   :  { %v2233_v63 = vpack.c.bf16 %v1788_v19, %v1787_v1  ;;  %v1775_v0 = vadd.f32 %v1774_v62, %v1671_v30 }
 0x3c7   :  { %v1790_v54 = vmax.f32 %v1780_v20, 0.0 }
 0x3c8   :  { %v1789_v22 = vmax.f32 %v1775_v0, 0.0  ;;  %2234 = vmatpush3.bf16.msra.mxu1 %v2233_v63 }
 0x3c9   :  { %2235 = vmatprep.subr.bf16.mxu1 %v2272_v16 }
 0x3ca   :  { %v2236_v10 = vpack.c.bf16 %v1790_v54, %v1789_v22 }
 0x3cc   :  { %2237 = vmatpush3.bf16.msra.mxu1 %v2236_v10 }
 0x3cf   :  { %2160 = vmatmul.mubr.msk.f32.vlgmr.msra.gmra.mrb[8].mxu1 %vm1798_vm1, %v1791_v6 }
 0x4a2   :  { %v1868_v24 = vpop.f32.mrb[8].mxu1 }
 0x4a3   :  { %v1869_v49 = vadd.f32 %v1868_v24, %v1796_v25  ;;  %v2161_v61 = vpop.f32.mrb[9].mxu1 }
 0x4a5   :  { %2245 = vtanh.f32 %v1869_v49 }
 0x4af   :  { %v2246_v57 = vpop.eup %2245 }
 0x4b0   :  { %v1873_v29 = vmul.f32 2.0, %v2246_v57 }
 0x4b2   :  { %1874 = vst [vmem:[#allocation2] sm:$0x3] %v1873_v29 }
 0x4b3   :  { %2258 = shalt.err (!%p2255_p4)
}
 0x4b4   :  { %s2259_s10 = scalar_lea.hbm %s3443_s9, 32 }
 0x4b5   :  { %p2260_p5 = scmp.ne.s32.totalorder %s3443_s9, %s2259_s10  ;;  %p2263_p6 = scmp.lt.u32.totalorder %s2259_s10, %s3443_s9 }
 0x4b7   :  { %p2265_p7 = pnand %p2263_p6, %p2260_p5 }
 0x4b9   :  { %2268 = shalt.err (!%p2265_p7)
}
 0x4ba   :  { %1884 = dma.vmem_to_hbm [thread:$0]  %s1882_s6, 32, %s3443_s9, [#allocation3]  }
 0x4bb   :  { %2269 = dma.done.wait [#allocation3], 32  }
 0x4bc   :  { %2270 = vsyncadd [#allocation3], 4294967264 }
 0x4bd   :  { %1888 = vsyncpa [#allocation3], 1 }

</bundles_post_ra>
